<compile_context>
chip_gen: v7x
topology: tpu7x:2x2x1
jax: 0.10.0
libtpu: 0.0.40
codegen_flags: <defaults>
</compile_context>

<pallas_src>
import functools

import jax
import jax.numpy as jnp
from jax import lax
from jax.experimental import pallas as pl
from jax.experimental.pallas import tpu as pltpu


def _round_up(x, m):
    return ((x + m - 1) // m) * m


def _mlp_kernel(x_ref, *refs, num_hidden, eps):
    """Fused MLP forward for one (TILE_M, input_dim) batch tile.

    refs layout: [w0, b0, gamma0, beta0, ..., w_{H-1}, b_{H-1}, gamma_{H-1},
                  beta_{H-1}, w_last, b_last, out_ref]
    Weights are bf16 (MXU-native); biases / LN params / statistics are f32.
    """
    out_ref = refs[-1]
    h = x_ref[...].astype(jnp.bfloat16)

    idx = 0
    for _ in range(num_hidden):
        w = refs[idx][...]            # bf16 (in, out)
        b = refs[idx + 1][...]        # f32  (1, out)
        gamma = refs[idx + 2][...]    # f32  (1, out)
        beta = refs[idx + 3][...]     # f32  (1, out)
        idx += 4

        # Linear: bf16 x bf16 on the MXU, f32 accumulate, f32 bias add.
        y = jnp.dot(h, w, preferred_element_type=jnp.float32) + b

        # LayerNorm over the feature (lane) axis -- single pass over y:
        # mean and E[y^2] together, var = E[y^2] - mean^2 (f32 stats).
        inv_n = 1.0 / y.shape[-1]
        mean = jnp.sum(y, axis=-1, keepdims=True) * inv_n
        mean_sq = jnp.sum(y * y, axis=-1, keepdims=True) * inv_n
        var = mean_sq - mean * mean
        y = (y - mean) * lax.rsqrt(var + eps) * gamma + beta

        # SiLU: y * sigmoid(y).  exp and the approx reciprocal both go to the
        # EUP slot, keeping VALU free.
        sig = pl.reciprocal(1.0 + jnp.exp(-y), approx=True)
        h = (y * sig).astype(jnp.bfloat16)

        # Dropout: eval-mode identity (see TODO at top of file).

    # Final layer: Linear only (final_norm / final_activation are Identity,
    # final_dropout_rate = 0.0).
    w_last = refs[idx][...]
    b_last = refs[idx + 1][...]
    out = jnp.dot(h, w_last, preferred_element_type=jnp.float32) + b_last
    out_ref[...] = out.astype(out_ref.dtype)


def init_mlp_params(key, input_dim, hidden_dims, output_dim):
    """Xavier-uniform weights stored (in, out) as bf16; f32 biases / LN params."""
    dims = [input_dim] + list(hidden_dims) + [output_dim]
    hidden = []
    final = None
    for i in range(len(dims) - 1):
        key, wk = jax.random.split(key)
        fan_in, fan_out = dims[i], dims[i + 1]
        a = (6.0 / (fan_in + fan_out)) ** 0.5
        w = jax.random.uniform(wk, (fan_in, fan_out), jnp.float32, -a, a)
        w = w.astype(jnp.bfloat16)
        b = jnp.zeros((fan_out,), jnp.float32)
        if i + 1 < len(dims) - 1:
            gamma = jnp.ones((fan_out,), jnp.float32)
            beta = jnp.zeros((fan_out,), jnp.float32)
            hidden.append((w, b, gamma, beta))
        else:
            final = (w, b)
    return hidden, final


def mlp_forward(x, params, *, eps=1e-5, tile_m=128):
    """Pallas-backed equivalent of MLP.forward (eval mode)."""
    hidden, (w_last, b_last) = params
    num_hidden = len(hidden)
    input_dim = x.shape[1]
    output_dim = w_last.shape[1]

    # --- batch tiling (grid over rows; weights stay resident) -------------
    m = x.shape[0]
    tile_m = min(tile_m, _round_up(m, 16))          # bf16 sublane packing
    padded_m = _round_up(m, tile_m)
    if padded_m != m:
        x = jnp.pad(x, ((0, padded_m - m), (0, 0)))
    num_tiles = padded_m // tile_m

    # --- flatten parameters (no wrapper-side cast of x) --------------------
    flat_params = []
    param_specs = []
    for (w, b, gamma, beta) in hidden:
        for p in (w, b.reshape(1, -1), gamma.reshape(1, -1), beta.reshape(1, -1)):
            flat_params.append(p)
            param_specs.append(
                pl.BlockSpec(p.shape, lambda i: (0, 0)))  # resident across grid
    for p in (w_last, b_last.reshape(1, -1)):
        flat_params.append(p)
        param_specs.append(pl.BlockSpec(p.shape, lambda i: (0, 0)))

    in_specs = [pl.BlockSpec((tile_m, input_dim), lambda i: (i, 0))] + param_specs
    out_specs = pl.BlockSpec((tile_m, output_dim), lambda i: (i, 0))
    out_shape = jax.ShapeDtypeStruct((padded_m, output_dim), jnp.float32)

    # --- cost estimate ------------------------------------------------------
    dims = [input_dim] + [w.shape[1] for (w, _, _, _) in hidden] + [output_dim]
    flops = 2 * padded_m * sum(dims[i] * dims[i + 1] for i in range(len(dims) - 1))
    transcendentals = padded_m * sum(dims[1:-1])     # one exp per hidden element
    param_bytes = sum(int(p.size) * p.dtype.itemsize for p in flat_params)
    io_bytes = (padded_m * input_dim * x.dtype.itemsize
                + padded_m * output_dim * 4)
    cost = pl.CostEstimate(flops=flops, transcendentals=transcendentals,
                           bytes_accessed=param_bytes + io_bytes)

    # --- VMEM budget: resident params + double-buffered x/out tiles + a few
    # f32 activation slabs; clamp to v7x's 64 MiB physical VMEM. ------------
    max_dim = max(dims)
    act_bytes = 4 * tile_m * max_dim * 4
    tile_io_bytes = 2 * tile_m * (input_dim * x.dtype.itemsize + output_dim * 4)
    vmem_limit = int(min(64 << 20,
                         max(32 << 20, 2 * (param_bytes + act_bytes + tile_io_bytes))))

    kernel = functools.partial(_mlp_kernel, num_hidden=num_hidden, eps=float(eps))

    out = pl.pallas_call(
        kernel,
        out_shape=out_shape,
        grid=(num_tiles,),
        in_specs=in_specs,
        out_specs=out_specs,
        compiler_params=pltpu.CompilerParams(
            dimension_semantics=("parallel",),
            vmem_limit_bytes=vmem_limit),
        cost_estimate=cost,
    )(x, *flat_params)

    return out[:m] if padded_m != m else out


def mlp_reference(x, params, *, eps=1e-5):
    """Pure-JAX reference mirroring the kernel's numerics (bf16 MXU operands,
    f32 accumulation / statistics) with eval-mode dropout."""
    hidden, (w_last, b_last) = params
    h = x.astype(jnp.bfloat16)
    for (w, b, gamma, beta) in hidden:
        y = jnp.dot(h, w, preferred_element_type=jnp.float32) + b
        mean = jnp.mean(y, axis=-1, keepdims=True)
        var = jnp.mean(jnp.square(y - mean), axis=-1, keepdims=True)
        y = (y - mean) * lax.rsqrt(var + eps) * gamma + beta
        h = (y * jax.nn.sigmoid(y)).astype(jnp.bfloat16)
    return jnp.dot(h, w_last, preferred_element_type=jnp.float32) + b_last


if __name__ == "__main__":
    key = jax.random.PRNGKey(0)
    key, xk = jax.random.split(key)

    # Small but lane-dense demo shapes (feature dims are multiples of 128,
    # batch is two 128-row tiles so the grid / both v7x TCs are exercised).
    batch, input_dim, hidden_dims, output_dim = 256, 128, [256, 256], 128
    params = init_mlp_params(key, input_dim, hidden_dims, output_dim)
    x = jax.random.normal(xk, (batch, input_dim), dtype=jnp.float32)

    out = mlp_forward(x, params)
    jax.block_until_ready(out)

    ref = mlp_reference(x, params)
    assert out.shape == (batch, output_dim), f"bad output shape {out.shape}"
    assert bool(jnp.allclose(out, ref, atol=3e-2, rtol=3e-2)), "MLP output mismatch"

    print("KERNEL_OK")
</pallas_src>

<mosaic_0001>
module attributes {stable_mosaic.version = 11 : i64} {
  func.func @_mlp_kernel(%arg0: i32, %arg1: memref<128x128xf32, #tpu.memory_space<vmem>>, %arg2: memref<128x256xbf16, #tpu.memory_space<vmem>>, %arg3: memref<1x256xf32, #tpu.memory_space<vmem>>, %arg4: memref<1x256xf32, #tpu.memory_space<vmem>>, %arg5: memref<1x256xf32, #tpu.memory_space<vmem>>, %arg6: memref<256x256xbf16, #tpu.memory_space<vmem>>, %arg7: memref<1x256xf32, #tpu.memory_space<vmem>>, %arg8: memref<1x256xf32, #tpu.memory_space<vmem>>, %arg9: memref<1x256xf32, #tpu.memory_space<vmem>>, %arg10: memref<256x128xbf16, #tpu.memory_space<vmem>>, %arg11: memref<1x128xf32, #tpu.memory_space<vmem>>, %arg12: memref<128x128xf32, #tpu.memory_space<vmem>>) attributes {dimension_semantics = [#tpu.dimension_semantics<parallel>], iteration_bounds = array<i64: 2>, scalar_prefetch = 0 : i64, scratch_operands = 0 : i64, tpu.core_type = #tpu.core_type<tc>, window_params = [{transform_indices = @transform_0, window_bounds = array<i64: 128, 128>}, {pipeline_mode = #tpu.pipeline_mode<synchronous>, transform_indices = @transform_1, window_bounds = array<i64: 128, 256>}, {pipeline_mode = #tpu.pipeline_mode<synchronous>, transform_indices = @transform_2, window_bounds = array<i64: 1, 256>}, {pipeline_mode = #tpu.pipeline_mode<synchronous>, transform_indices = @transform_3, window_bounds = array<i64: 1, 256>}, {pipeline_mode = #tpu.pipeline_mode<synchronous>, transform_indices = @transform_4, window_bounds = array<i64: 1, 256>}, {pipeline_mode = #tpu.pipeline_mode<synchronous>, transform_indices = @transform_5, window_bounds = array<i64: 256, 256>}, {pipeline_mode = #tpu.pipeline_mode<synchronous>, transform_indices = @transform_6, window_bounds = array<i64: 1, 256>}, {pipeline_mode = #tpu.pipeline_mode<synchronous>, transform_indices = @transform_7, window_bounds = array<i64: 1, 256>}, {pipeline_mode = #tpu.pipeline_mode<synchronous>, transform_indices = @transform_8, window_bounds = array<i64: 1, 256>}, {pipeline_mode = #tpu.pipeline_mode<synchronous>, transform_indices = @transform_9, window_bounds = array<i64: 256, 128>}, {pipeline_mode = #tpu.pipeline_mode<synchronous>, transform_indices = @transform_10, window_bounds = array<i64: 1, 128>}, {transform_indices = @transform_11, window_bounds = array<i64: 128, 128>}]} {
    %c0 = arith.constant 0 : index
    %c0_0 = arith.constant 0 : index
    %0 = vector.load %arg1[%c0, %c0_0] : memref<128x128xf32, #tpu.memory_space<vmem>>, vector<128x128xf32>
    %1 = arith.truncf %0 : vector<128x128xf32> to vector<128x128xbf16>
    %c0_1 = arith.constant 0 : index
    %c0_2 = arith.constant 0 : index
    %2 = vector.load %arg2[%c0_1, %c0_2] : memref<128x256xbf16, #tpu.memory_space<vmem>>, vector<128x256xbf16>
    %c0_3 = arith.constant 0 : index
    %c0_4 = arith.constant 0 : index
    %3 = vector.load %arg3[%c0_3, %c0_4] : memref<1x256xf32, #tpu.memory_space<vmem>>, vector<1x256xf32>
    %c0_5 = arith.constant 0 : index
    %c0_6 = arith.constant 0 : index
    %4 = vector.load %arg4[%c0_5, %c0_6] : memref<1x256xf32, #tpu.memory_space<vmem>>, vector<1x256xf32>
    %c0_7 = arith.constant 0 : index
    %c0_8 = arith.constant 0 : index
    %5 = vector.load %arg5[%c0_7, %c0_8] : memref<1x256xf32, #tpu.memory_space<vmem>>, vector<1x256xf32>
    %cst = arith.constant dense<0.000000e+00> : vector<128x256xf32>
    %6 = tpu.matmul %1, %2, %cst {dimension_numbers = #tpu.dot_dimension_numbers<[1], [0], [0], [1], [0, 0, 1, 1], [], []>} : vector<128x128xbf16>, vector<128x256xbf16>, vector<128x256xf32> -> vector<128x256xf32>
    %7 = vector.broadcast %3 : vector<1x256xf32> to vector<128x256xf32>
    %8 = arith.addf %6, %7 : vector<128x256xf32>
    %cst_9 = arith.constant dense<0.000000e+00> : vector<128xf32>
    %9 = vector.multi_reduction <add>, %8, %cst_9 [1] : vector<128x256xf32> to vector<128xf32>
    %10 = vector.shape_cast %9 : vector<128xf32> to vector<128x1xf32>
    %cst_10 = arith.constant 3.906250e-03 : f32
    %11 = vector.broadcast %cst_10 : f32 to vector<128x1xf32>
    %12 = arith.mulf %10, %11 : vector<128x1xf32>
    %13 = arith.mulf %8, %8 : vector<128x256xf32>
    %cst_11 = arith.constant dense<0.000000e+00> : vector<128xf32>
    %14 = vector.multi_reduction <add>, %13, %cst_11 [1] : vector<128x256xf32> to vector<128xf32>
    %15 = vector.shape_cast %14 : vector<128xf32> to vector<128x1xf32>
    %cst_12 = arith.constant 3.906250e-03 : f32
    %16 = vector.broadcast %cst_12 : f32 to vector<128x1xf32>
    %17 = arith.mulf %15, %16 : vector<128x1xf32>
    %18 = arith.mulf %12, %12 : vector<128x1xf32>
    %19 = arith.subf %17, %18 : vector<128x1xf32>
    %20 = vector.broadcast %12 : vector<128x1xf32> to vector<128x256xf32>
    %21 = arith.subf %8, %20 : vector<128x256xf32>
    %cst_13 = arith.constant 9.99999974E-6 : f32
    %22 = vector.broadcast %cst_13 : f32 to vector<128x1xf32>
    %23 = arith.addf %19, %22 : vector<128x1xf32>
    %24 = math.rsqrt %23 : vector<128x1xf32>
    %25 = vector.broadcast %24 : vector<128x1xf32> to vector<128x256xf32>
    %26 = arith.mulf %21, %25 : vector<128x256xf32>
    %27 = vector.broadcast %4 : vector<1x256xf32> to vector<128x256xf32>
    %28 = arith.mulf %26, %27 : vector<128x256xf32>
    %29 = vector.broadcast %5 : vector<1x256xf32> to vector<128x256xf32>
    %30 = arith.addf %28, %29 : vector<128x256xf32>
    %cst_14 = arith.constant 0.000000e+00 : f32
    %31 = vector.broadcast %cst_14 : f32 to vector<128x256xf32>
    %32 = arith.subf %31, %30 : vector<128x256xf32>
    %33 = math.exp %32 : vector<128x256xf32>
    %cst_15 = arith.constant 1.000000e+00 : f32
    %34 = vector.broadcast %cst_15 : f32 to vector<128x256xf32>
    %35 = arith.addf %34, %33 : vector<128x256xf32>
    %36 = tpu.reciprocal %35 {approx = true} : vector<128x256xf32> -> vector<128x256xf32>
    %37 = arith.mulf %30, %36 : vector<128x256xf32>
    %38 = arith.truncf %37 : vector<128x256xf32> to vector<128x256xbf16>
    %c0_16 = arith.constant 0 : index
    %c0_17 = arith.constant 0 : index
    %39 = vector.load %arg6[%c0_16, %c0_17] : memref<256x256xbf16, #tpu.memory_space<vmem>>, vector<256x256xbf16>
    %c0_18 = arith.constant 0 : index
    %c0_19 = arith.constant 0 : index
    %40 = vector.load %arg7[%c0_18, %c0_19] : memref<1x256xf32, #tpu.memory_space<vmem>>, vector<1x256xf32>
    %c0_20 = arith.constant 0 : index
    %c0_21 = arith.constant 0 : index
    %41 = vector.load %arg8[%c0_20, %c0_21] : memref<1x256xf32, #tpu.memory_space<vmem>>, vector<1x256xf32>
    %c0_22 = arith.constant 0 : index
    %c0_23 = arith.constant 0 : index
    %42 = vector.load %arg9[%c0_22, %c0_23] : memref<1x256xf32, #tpu.memory_space<vmem>>, vector<1x256xf32>
    %cst_24 = arith.constant dense<0.000000e+00> : vector<128x256xf32>
    %43 = tpu.matmul %38, %39, %cst_24 {dimension_numbers = #tpu.dot_dimension_numbers<[1], [0], [0], [1], [0, 0, 1, 1], [], []>} : vector<128x256xbf16>, vector<256x256xbf16>, vector<128x256xf32> -> vector<128x256xf32>
    %44 = vector.broadcast %40 : vector<1x256xf32> to vector<128x256xf32>
    %45 = arith.addf %43, %44 : vector<128x256xf32>
    %cst_25 = arith.constant dense<0.000000e+00> : vector<128xf32>
    %46 = vector.multi_reduction <add>, %45, %cst_25 [1] : vector<128x256xf32> to vector<128xf32>
    %47 = vector.shape_cast %46 : vector<128xf32> to vector<128x1xf32>
    %cst_26 = arith.constant 3.906250e-03 : f32
    %48 = vector.broadcast %cst_26 : f32 to vector<128x1xf32>
    %49 = arith.mulf %47, %48 : vector<128x1xf32>
    %50 = arith.mulf %45, %45 : vector<128x256xf32>
    %cst_27 = arith.constant dense<0.000000e+00> : vector<128xf32>
    %51 = vector.multi_reduction <add>, %50, %cst_27 [1] : vector<128x256xf32> to vector<128xf32>
    %52 = vector.shape_cast %51 : vector<128xf32> to vector<128x1xf32>
    %cst_28 = arith.constant 3.906250e-03 : f32
    %53 = vector.broadcast %cst_28 : f32 to vector<128x1xf32>
    %54 = arith.mulf %52, %53 : vector<128x1xf32>
    %55 = arith.mulf %49, %49 : vector<128x1xf32>
    %56 = arith.subf %54, %55 : vector<128x1xf32>
    %57 = vector.broadcast %49 : vector<128x1xf32> to vector<128x256xf32>
    %58 = arith.subf %45, %57 : vector<128x256xf32>
    %cst_29 = arith.constant 9.99999974E-6 : f32
    %59 = vector.broadcast %cst_29 : f32 to vector<128x1xf32>
    %60 = arith.addf %56, %59 : vector<128x1xf32>
    %61 = math.rsqrt %60 : vector<128x1xf32>
    %62 = vector.broadcast %61 : vector<128x1xf32> to vector<128x256xf32>
    %63 = arith.mulf %58, %62 : vector<128x256xf32>
    %64 = vector.broadcast %41 : vector<1x256xf32> to vector<128x256xf32>
    %65 = arith.mulf %63, %64 : vector<128x256xf32>
    %66 = vector.broadcast %42 : vector<1x256xf32> to vector<128x256xf32>
    %67 = arith.addf %65, %66 : vector<128x256xf32>
    %cst_30 = arith.constant 0.000000e+00 : f32
    %68 = vector.broadcast %cst_30 : f32 to vector<128x256xf32>
    %69 = arith.subf %68, %67 : vector<128x256xf32>
    %70 = math.exp %69 : vector<128x256xf32>
    %cst_31 = arith.constant 1.000000e+00 : f32
    %71 = vector.broadcast %cst_31 : f32 to vector<128x256xf32>
    %72 = arith.addf %71, %70 : vector<128x256xf32>
    %73 = tpu.reciprocal %72 {approx = true} : vector<128x256xf32> -> vector<128x256xf32>
    %74 = arith.mulf %67, %73 : vector<128x256xf32>
    %75 = arith.truncf %74 : vector<128x256xf32> to vector<128x256xbf16>
    %c0_32 = arith.constant 0 : index
    %c0_33 = arith.constant 0 : index
    %76 = vector.load %arg10[%c0_32, %c0_33] : memref<256x128xbf16, #tpu.memory_space<vmem>>, vector<256x128xbf16>
    %c0_34 = arith.constant 0 : index
    %c0_35 = arith.constant 0 : index
    %77 = vector.load %arg11[%c0_34, %c0_35] : memref<1x128xf32, #tpu.memory_space<vmem>>, vector<1x128xf32>
    %cst_36 = arith.constant dense<0.000000e+00> : vector<128x128xf32>
    %78 = tpu.matmul %75, %76, %cst_36 {dimension_numbers = #tpu.dot_dimension_numbers<[1], [0], [0], [1], [0, 0, 1, 1], [], []>} : vector<128x256xbf16>, vector<256x128xbf16>, vector<128x128xf32> -> vector<128x128xf32>
    %79 = vector.broadcast %77 : vector<1x128xf32> to vector<128x128xf32>
    %80 = arith.addf %78, %79 : vector<128x128xf32>
    %c0_37 = arith.constant 0 : index
    %c0_38 = arith.constant 0 : index
    %81 = vector.load %arg12[%c0_37, %c0_38] : memref<128x128xf32, #tpu.memory_space<vmem>>, vector<128x128xf32>
    tpu.vector_store %arg12[%c0_37, %c0_38], %80 {strides = array<i32>} : memref<128x128xf32, #tpu.memory_space<vmem>>, vector<128x128xf32>,
    return
  }
  func.func @transform_0(%arg0: i32) -> (i32, i32) {
    %c0_i32 = arith.constant 0 : i32
    %c0_i32_0 = arith.constant 0 : i32
    return %arg0, %c0_i32 : i32, i32
  }
  func.func @transform_1(%arg0: i32) -> (i32, i32) {
    %c0_i32 = arith.constant 0 : i32
    %c0_i32_0 = arith.constant 0 : i32
    %c0_i32_1 = arith.constant 0 : i32
    return %c0_i32, %c0_i32_0 : i32, i32
  }
  func.func @transform_2(%arg0: i32) -> (i32, i32) {
    %c0_i32 = arith.constant 0 : i32
    %c0_i32_0 = arith.constant 0 : i32
    %c0_i32_1 = arith.constant 0 : i32
    return %c0_i32, %c0_i32_0 : i32, i32
  }
  func.func @transform_3(%arg0: i32) -> (i32, i32) {
    %c0_i32 = arith.constant 0 : i32
    %c0_i32_0 = arith.constant 0 : i32
    %c0_i32_1 = arith.constant 0 : i32
    return %c0_i32, %c0_i32_0 : i32, i32
  }
  func.func @transform_4(%arg0: i32) -> (i32, i32) {
    %c0_i32 = arith.constant 0 : i32
    %c0_i32_0 = arith.constant 0 : i32
    %c0_i32_1 = arith.constant 0 : i32
    return %c0_i32, %c0_i32_0 : i32, i32
  }
  func.func @transform_5(%arg0: i32) -> (i32, i32) {
    %c0_i32 = arith.constant 0 : i32
    %c0_i32_0 = arith.constant 0 : i32
    %c0_i32_1 = arith.constant 0 : i32
    return %c0_i32, %c0_i32_0 : i32, i32
  }
  func.func @transform_6(%arg0: i32) -> (i32, i32) {
    %c0_i32 = arith.constant 0 : i32
    %c0_i32_0 = arith.constant 0 : i32
    %c0_i32_1 = arith.constant 0 : i32
    return %c0_i32, %c0_i32_0 : i32, i32
  }
  func.func @transform_7(%arg0: i32) -> (i32, i32) {
    %c0_i32 = arith.constant 0 : i32
    %c0_i32_0 = arith.constant 0 : i32
    %c0_i32_1 = arith.constant 0 : i32
    return %c0_i32, %c0_i32_0 : i32, i32
  }
  func.func @transform_8(%arg0: i32) -> (i32, i32) {
    %c0_i32 = arith.constant 0 : i32
    %c0_i32_0 = arith.constant 0 : i32
    %c0_i32_1 = arith.constant 0 : i32
    return %c0_i32, %c0_i32_0 : i32, i32
  }
  func.func @transform_9(%arg0: i32) -> (i32, i32) {
    %c0_i32 = arith.constant 0 : i32
    %c0_i32_0 = arith.constant 0 : i32
    %c0_i32_1 = arith.constant 0 : i32
    return %c0_i32, %c0_i32_0 : i32, i32
  }
  func.func @transform_10(%arg0: i32) -> (i32, i32) {
    %c0_i32 = arith.constant 0 : i32
    %c0_i32_0 = arith.constant 0 : i32
    %c0_i32_1 = arith.constant 0 : i32
    return %c0_i32, %c0_i32_0 : i32, i32
  }
  func.func @transform_11(%arg0: i32) -> (i32, i32) {
    %c0_i32 = arith.constant 0 : i32
    %c0_i32_0 = arith.constant 0 : i32
    return %arg0, %c0_i32 : i32, i32
  }
}

</mosaic_0001>

<bundles_post_ra>
// kernel: tpu_custom_call.1
= control target key start
LH: loop header
LB: loop body
LE: loop exit
PB: predicated region body
PF: predicated region fallthrough
CT: control target
= control target key end

     0   :  { %s5101_s0 = inlined_call_operand.hbm [shape: f32[256,128], index: 0, kind: input, shape index: {}]   ;;  %s5102_s1 = inlined_call_operand.hbm [shape: bf16[128,256], index: 1, kind: input, shape index: {}]   ;;  %s5103_s2 = inlined_call_operand.vmem [shape: f32[1,256], index: 2, kind: input, shape index: {}]   ;;  %s5104_s3 = inlined_call_operand.vmem [shape: f32[1,256], index: 3, kind: input, shape index: {}]   ;;  %s5105_s4 = inlined_call_operand.vmem [shape: f32[1,256], index: 4, kind: input, shape index: {}]   ;;  %s5106_s5 = inlined_call_operand.hbm [shape: bf16[256,256], index: 5, kind: input, shape index: {}]   ;;  %s5107_s6 = inlined_call_operand.vmem [shape: f32[1,256], index: 6, kind: input, shape index: {}]   ;;  %s5108_s7 = inlined_call_operand.vmem [shape: f32[1,256], index: 7, kind: input, shape index: {}]   ;;  %s5109_s8 = inlined_call_operand.vmem [shape: f32[1,256], index: 8, kind: input, shape index: {}]   ;;  %s5110_s9 = inlined_call_operand.hbm [shape: bf16[256,128], index: 9, kind: input, shape index: {}]   ;;  %s5111_s10 = inlined_call_operand.vmem [shape: f32[1,128], index: 10, kind: input, shape index: {}]   ;;  %s5112_s11 = inlined_call_operand.hbm [shape: f32[256,128], index: 11, kind: output, shape index: {}]  }
   0x1   :  { %5133 = sst [smem:[#allocation27_spill]] %s5109_s8 }
   0x2   :  { %5134 = sst [smem:[#allocation28_spill]] %s5111_s10 }
   0x3   :  { %5135 = sst [smem:[#allocation29_spill]] %s5112_s11 }
   0x4   :  { %16 = vsyncpa [#allocation3], 0 }
   0x5   :  { %18 = vsyncpa [#allocation3 + $0x1], 0 }
   0x6   :  { %19 = vsyncpa [#allocation6], 0 }
   0x7   :  { %20 = vsyncpa [#allocation9], 0 }
   0x8   :  { %21 = vsyncpa [#allocation4], 0 }
   0x9   :  { %23 = vsyncpa [#allocation4 + $0x1], 0  ;;  %s3467_s17 = smov 0   ;;  %s3469_s18 = smov 0  }
   0xa   :  { %s3471_s19 = smov 0   ;;  %s3473_s20 = smov 0  }
   0xb LB: > { %5136 = sst [smem:[#allocation15_spill]] %s3381_s17  ;;  %s3488_s21 = sadd.s32 4294967295, %s3393_s20   ;;  %s3393_s20 = sphi %s3473_s20, %s5229_s20   ;;  %s3389_s19 = sphi %s3471_s19, %s5228_s19   ;;  %s3385_s18 = sphi %s3469_s18, %s5227_s18   ;;  %s3381_s17 = sphi %s3467_s17, %s5226_s17  }
   0xc   : > { %s2546_s22 = sadd.s32 4294967294, %s3393_s20   ;;  %p49_p0 = scmp.ne.s32.totalorder %s3385_s18, %s3381_s17 }
   0xd   : > { %p5114_p1 = scmp.eq.s32.totalorder %s3488_s21, 0  ;;  %p289_p3 = scmp.eq.s32.totalorder %s2546_s22, 1 }
   0xe   : > { %p2547_p5 = scmp.ge.s32.totalorder %s3393_s20, 1  ;;  %p296_p7 = scmp.lt.s32.totalorder %s3393_s20, 3 }
   0xf   : > { %p3497_p4 = por %p5114_p1, %p49_p0  ;;  %p3502_p6 = por %p289_p3, %p49_p0 }
  0x10   : > { %p3507_p8 = pnand %p2547_p5, %p296_p7  ;;  %s3395_s26 = smov [#allocation5]  }
  0x11   : > { %s5137_s23 = scalar_select %p3497_p4, 1, 0 }
  0x12   : > { %s5138_s24 = scalar_select %p3502_p6, 1, 0 }
  0x13   : > { %s5140_s25 = scalar_select %p3507_p8, 1, 0 }
  0x14   : > { %5139 = sst [smem:[#allocation16_spill]] %s5138_s24  ;;  %s308_s27 = sshll.u32 %s3395_s26, 4  ;;  %s3511_s27 = int_to_ptr.vmem [resolvable:$true] %s308_s27 }
  0x15   : > { %p2729_p9 = pneg %p3507_p8  ;;  %s3396_s29 = smov [#allocation7]  }
  0x16   : > { %s330_s30 = sshll.u32 %s3396_s29, 4  ;;  %s3397_s12 = smov [#allocation8]   ;;  %s3522_s30 = int_to_ptr.vmem [resolvable:$true] %s330_s30 }
  0x17   : > { %p3518_p11 = pnand %p2729_p9, %p5114_p1  ;;  %s3524_s13 = sshll.u32 %s3397_s12, 4  ;;  %s353_s13 = int_to_ptr.vmem [resolvable:$true] %s3524_s13 }
  0x18   : > { %s3205_s16 = scalar_lea.hbm %s5102_s1, 2048 }
  0x19   : > { %p3206_p12 = scmp.ne.s32.totalorder %s5102_s1, %s3205_s16  ;;  %p3534_p13 = pneg %p3518_p11 }
  0x1a   : > { %p3212_p5 = scmp.lt.u32.totalorder %s3205_s16, %s5102_s1 }
  0x1b   : > { %p3208_p0 = pnand %p3534_p13, %p3206_p12 }
  0x1d   : > { %p3209_p3 = pneg %p3208_p0 }
  0x1f   : > { %p3214_p7 = pnand %p3212_p5, %p3209_p3 }
  0x21   : > { %3217 = shalt.err (!%p3214_p7)
}
  0x22   : > { %s3218_s14 = scalar_lea.vmem %s3511_s27, 2048  ;;  %p3226_p2 = scmp.lt.s32.totalorder %s3511_s27, %s3511_s27 }
  0x23   : > { %p3219_p9 = scmp.ne.s32.totalorder %s3511_s27, %s3218_s14  ;;  %p3227_p6 = scmp.lt.s32.totalorder %s3218_s14, %s3218_s14 }
  0x25   : > { %p3221_p10 = pnand %p3219_p9, %p3534_p13  ;;  %p3228_p12 = por %p3227_p6, %p3226_p2 }
  0x27   : > { %p3222_p1 = pneg %p3221_p10 }
  0x29   : > { %p3229_p0 = pnand %p3228_p12, %p3222_p1 }
  0x2b   : > { %3232 = shalt.err (!%p3229_p0)
}
  0x2c   : > { %s3398_s15 = smov 128   ;;  %s3399_s16 = smov 8  }
  0x2d   : > { %2732 = dma.hbm_to_vmem [thread:$0]  (!%p3518_p11), %s5102_s1, 2048, %s3511_s27, [#allocation6], %s3398_s15, %s3398_s15, %s3399_s16  }
  0x2e   : > { %s3233_s14 = scalar_lea.hbm %s5106_s5, 4096 }
  0x2f   : > { %p3234_p1 = scmp.ne.s32.totalorder %s5106_s5, %s3233_s14  ;;  %p3240_p10 = scmp.lt.u32.totalorder %s3233_s14, %s5106_s5 }
  0x31   : > { %p3236_p2 = pnand %p3234_p1, %p3534_p13 }
  0x33   : > { %p3237_p6 = pneg %p3236_p2 }
  0x35   : > { %p3242_p3 = pnand %p3240_p10, %p3237_p6 }
  0x37   : > { %3245 = shalt.err (!%p3242_p3)
}
  0x38   : > { %s3246_s27 = scalar_lea.vmem %s3522_s30, 4096  ;;  %p3254_p12 = scmp.lt.s32.totalorder %s3522_s30, %s3522_s30 }
  0x39   : > { %p3247_p5 = scmp.ne.s32.totalorder %s3522_s30, %s3246_s27  ;;  %p3255_p0 = scmp.lt.s32.totalorder %s3246_s27, %s3246_s27 }
  0x3b   : > { %p3249_p7 = pnand %p3247_p5, %p3534_p13  ;;  %p3256_p1 = por %p3255_p0, %p3254_p12 }
  0x3d   : > { %p3250_p9 = pneg %p3249_p7 }
  0x3f   : > { %p3257_p2 = pnand %p3256_p1, %p3250_p9 }
  0x41   : > { %3260 = shalt.err (!%p3257_p2)
}
  0x42   : > { %2735 = dma.hbm_to_vmem [thread:$0]  (!%p3518_p11), %s5106_s5, 4096, %s3522_s30, [#allocation6], %s3398_s15, %s3398_s15, %s3399_s16  }
  0x43   : > { %s3261_s22 = scalar_lea.hbm %s5110_s9, 2048 }
  0x44   : > { %p3262_p6 = scmp.ne.s32.totalorder %s5110_s9, %s3261_s22  ;;  %p3268_p5 = scmp.lt.u32.totalorder %s3261_s22, %s5110_s9 }
  0x46   : > { %p3264_p10 = pnand %p3262_p6, %p3534_p13 }
  0x48   : > { %p3265_p3 = pneg %p3264_p10 }
  0x4a   : > { %p3270_p7 = pnand %p3268_p5, %p3265_p3 }
  0x4c   : > { %3273 = shalt.err (!%p3270_p7)
}
  0x4d   : > { %s3274_s27 = scalar_lea.vmem %s353_s13, 2048  ;;  %p3282_p1 = scmp.lt.s32.totalorder %s353_s13, %s353_s13 }
  0x4e   : > { %p3275_p9 = scmp.ne.s32.totalorder %s353_s13, %s3274_s27  ;;  %p3283_p2 = scmp.lt.s32.totalorder %s3274_s27, %s3274_s27 }
  0x50   : > { %p3277_p12 = pnand %p3275_p9, %p3534_p13  ;;  %p3284_p4 = por %p3283_p2, %p3282_p1 }
  0x52   : > { %p3278_p0 = pneg %p3277_p12 }
  0x54   : > { %p3285_p8 = pnand %p3284_p4, %p3278_p0 }
  0x56   : > { %3288 = shalt.err (!%p3285_p8)
}
  0x57   : > { %s3400_s30 = smov 64   ;;  %s3401_s24 = smov 4  }
  0x58   : > { %2738 = dma.hbm_to_vmem [thread:$0]  (!%p3518_p11), %s5110_s9, 2048, %s353_s13, [#allocation9], %s3400_s30, %s3400_s30, %s3401_s24  }
  0x59   : > { %s3604_s11 = sadd.s32 1, %s3393_s20   ;;  %s36_s22 = sadd.s32 1, %s3389_s19 }
  0x5a   : > { %s33_s17 = ssub.s32 %s3393_s20, %s3604_s11  ;;  %p43_p8 = scmp.ne.s32.totalorder %s3389_s19, %s3385_s18 }
  0x5b   : > { %p34_p4 = scmp.eq.s32.totalorder %s33_s17, 0  ;;  %p44_p13 = scmp.eq.s32.totalorder %s3393_s20, 0 }
  0x5c   : > { %p2750_p6 = scmp.lt.s32.totalorder %s3393_s20, 2  ;;  %p5143_p3 = scmp.eq.s32.totalorder %s3488_s21, 1 }
  0x5d   : > { %s3614_s26 = scalar_select %p34_p4, %s3389_s19, %s36_s22  }
  0x5e   : > { %p45_p10 = por %p44_p13, %p43_p8  ;;  %p3618_p5 = por %p5143_p3, %p43_p8 }
  0x5f   : > { %s369_s28 = sand.u32 1, %s3389_s19   ;;  %s2631_s12 = sshll.u32 %s3393_s20, 11 }
  0x60   : > { %s2552_s13 = sshll.u32 %s369_s28, 7  ;;  %s3627_s30 = scalar_lea.hbm %s5101_s0, %s2631_s12 }
  0x61   : > { %s373_s24 = scalar_lea.vmem [#allocation2], %s2552_s13  ;;  %p3629_p11 = pnand %p2750_p6, %p45_p10 }
  0x62   : > { %s380_s8 = sshll.u32 %s373_s24, 4  ;;  %s3635_s17 = scalar_lea.sflag [#allocation3], %s369_s28  ;;  %s3633_s8 = int_to_ptr.vmem [resolvable:$true] %s380_s8 }
  0x63   : > { %s3289_s22 = scalar_lea.hbm %s3627_s30, 2048  ;;  %p3291_p9 = pneg %p3629_p11 }
  0x64   : > { %p3290_p7 = scmp.ne.s32.totalorder %s3627_s30, %s3289_s22  ;;  %s3294_s14 = scalar_lea.hbm %s5101_s0, 4096 }
  0x65   : > { %p3295_p1 = scmp.lt.u32.totalorder %s3627_s30, %s5101_s0  ;;  %p3296_p2 = scmp.lt.u32.totalorder %s3294_s14, %s3289_s22 }
  0x66   : > { %p3292_p12 = pnand %p3291_p9, %p3290_p7  ;;  %p3298_p8 = scmp.lt.u32.totalorder %s3289_s22, %s3627_s30 }
  0x67   : > { %p3297_p4 = por %p3296_p2, %p3295_p1 }
  0x68   : > { %p3293_p0 = pneg %p3292_p12 }
  0x69   : > { %p3299_p13 = por %p3298_p8, %p3297_p4 }
  0x6b   : > { %p3300_p6 = pnand %p3299_p13, %p3293_p0 }
  0x6d   : > { %3303 = shalt.err (!%p3300_p6)
}
  0x6e   : > { %s3304_s28 = scalar_lea.vmem %s3633_s8, 2048  ;;  %s3402_s12 = smov [#allocation2]  }
  0x6f   : > { %p3305_p10 = scmp.ne.s32.totalorder %s3633_s8, %s3304_s28  ;;  %s3309_s13 = sshll.u32 %s3402_s12, 4  ;;  %s3310_s13 = int_to_ptr.vmem [resolvable:$false] %s3309_s13 }
  0x70   : > { %s3311_s27 = scalar_lea.vmem %s3310_s13, 4096  ;;  %p3312_p12 = scmp.lt.s32.totalorder %s3633_s8, %s3310_s13 }
  0x71   : > { %p3307_p3 = pnand %p3305_p10, %p3291_p9  ;;  %p3313_p1 = scmp.lt.s32.totalorder %s3311_s27, %s3304_s28 }
  0x73   : > { %p3308_p7 = pneg %p3307_p3  ;;  %p3314_p2 = por %p3313_p1, %p3312_p12 }
  0x75   : > { %p3315_p4 = pnand %p3314_p2, %p3308_p7 }
  0x77   : > { %3318 = shalt.err (!%p3315_p4)
}
  0x78   : > { %2742 = dma.hbm_to_vmem [thread:$0]  (!%p3629_p11), %s3627_s30, 2048, %s3633_s8, %s3635_s17, %s3398_s15, %s3398_s15, %s3399_s16  }
  0x79   : > { %p5146_p9 = scmp.ne.s32.totalorder %s5140_s25, 0 }
  0x7b   : > { %392 = sbr.rel (%p5146_p9) target bundleno = 1352 (0x548), region = 64 }
  0x82   : > { %s3669_s22 = sand.u32 1, %s3385_s18   ;;  %p5147_p0 = scmp.ne.s32.totalorder %s5137_s23, 0 }
  0x83   : > { %s2556_s14 = sshll.u32 %s3669_s22, 7  ;;  %s395_s24 = scalar_lea.sflag [#allocation3], %s3669_s22 }
  0x84   : > { %s3675_s10 = scalar_lea.vmem [#allocation2], %s2556_s14 }
  0x85   : > { %3364 = dma.done.wait (%p5147_p0), %s395_s24, 2048  }
  0x86   : > { %3366 = vsyncadd (%p5147_p0), %s395_s24, 4294965248  ;;  %p5148_p11 = scmp.eq.s32.totalorder %s3488_s21, 0 }
  0x88   : > { %3368 = dma.done.wait (%p5148_p11), [#allocation6], 6144   ;;  %p5149_p8 = pmov %p5148_p11 }
  0x8a   : > { %3370 = vsyncadd (%p5149_p8), [#allocation6], 4294961152  ;;  %p5150_p13 = pmov %p5149_p8 }
  0x8b   : > { %p5151_p6 = pmov %p5149_p8 }
  0x8c   : > { %3372 = dma.done.wait (%p5150_p13), [#allocation9], 2048  }
  0x8d   : > { %3374 = vsyncadd (%p5151_p6), [#allocation9], 4294965248  ;;  %v3403_v0 = vmov 0   ;;  %v2797_v1 = vld [vmem:[#allocation5 + $0x4] ss:$8 sps:$4 sm:$0xff]   ;;  %v454_v20 = vld [vmem:[%s3675_s10 + $0x10] sm:$0xff]  ;;  %v496_v43 = vlaneseq }
  0x8e   : > { %618 = vmatprep.mubr.bf16.mxu0 %v3403_v0  ;;  %v2799_v2 = vld [vmem:[#allocation5] ss:$8 sps:$4 sm:$0xff]   ;;  %586 = vmatprep.subr.bf16.mxu0 %v2797_v1  ;;  %v2800_v3 = vld [vmem:[#allocation5 + $0x14] ss:$8 sps:$4 sm:$0xff]   ;;  %v2802_v4 = vld [vmem:[#allocation5 + $0x10] ss:$8 sps:$4 sm:$0xff]  }
  0x8f   : > { %587 = vmatpush1.bf16.msra.mxu0 %v2799_v2  ;;  %v2803_v5 = vld [vmem:[#allocation5 + $0x24] ss:$8 sps:$4 sm:$0xff]   ;;  %v2805_v6 = vld [vmem:[#allocation5 + $0x20] ss:$8 sps:$4 sm:$0xff]   ;;  %v2806_v7 = vld [vmem:[#allocation5 + $0x34] ss:$8 sps:$4 sm:$0xff]  }
  0x90   : > { %588 = vmatprep.subr.bf16.mxu0 %v2800_v3  ;;  %v2808_v8 = vld [vmem:[#allocation5 + $0x30] ss:$8 sps:$4 sm:$0xff]   ;;  %v2809_v9 = vld [vmem:[#allocation5 + $0x44] ss:$8 sps:$4 sm:$0xff]   ;;  %v2811_v10 = vld [vmem:[#allocation5 + $0x40] ss:$8 sps:$4 sm:$0xff]  }
  0x91   : > { %v2812_v11 = vld [vmem:[#allocation5 + $0x54] ss:$8 sps:$4 sm:$0xff]   ;;  %v2814_v12 = vld [vmem:[#allocation5 + $0x50] ss:$8 sps:$4 sm:$0xff]   ;;  %v2815_v13 = vld [vmem:[#allocation5 + $0x64] ss:$8 sps:$4 sm:$0xff]  }
  0x92   : > { %v2817_v14 = vld [vmem:[#allocation5 + $0x60] ss:$8 sps:$4 sm:$0xff]   ;;  %v2818_v15 = vld [vmem:[#allocation5 + $0x74] ss:$8 sps:$4 sm:$0xff]   ;;  %v2820_v16 = vld [vmem:[#allocation5 + $0x70] ss:$8 sps:$4 sm:$0xff]  }
  0x93   : > { %589 = vmatpush1.bf16.msra.mxu0 %v2802_v4  ;;  %v452_v17 = vld [vmem:[%s3675_s10] sm:$0xff]  ;;  %v453_v18 = vld [vmem:[%s3675_s10 + $0x8] sm:$0xff]  ;;  %v455_v21 = vld [vmem:[%s3675_s10 + $0x18] sm:$0xff]  ;;  %v497_v44 = vshrl.u32 %v496_v43, 7  ;;  %s5220_s15 = sld [smem:[#allocation28_spill]]  ;;  %s5017_s16 = scalar_lea.vmem [#allocation10], %s2556_s14 }
  0x94   : > { %590 = vmatprep.subr.bf16.mxu0 %v2803_v5  ;;  %v468_v19 = vpack.c.bf16 %v453_v18, %v452_v17  ;;  %v469_v22 = vpack.c.bf16 %v455_v21, %v454_v20  ;;  %v456_v23 = vld [vmem:[%s3675_s10 + $0x20] sm:$0xff]  ;;  %v457_v24 = vld [vmem:[%s3675_s10 + $0x28] sm:$0xff]  ;;  %v458_v26 = vld [vmem:[%s3675_s10 + $0x30] sm:$0xff]  ;;  %s2632_s14 = sshll.u32 %s3488_s21, 11  ;;  %s2444_s30 = sshll.u32 %s5017_s16, 4  ;;  %s5054_s30 = int_to_ptr.vmem [resolvable:$true] %s2444_s30 }
  0x95   : > { %v470_v25 = vpack.c.bf16 %v457_v24, %v456_v23  ;;  %v459_v27 = vld [vmem:[%s3675_s10 + $0x38] sm:$0xff]  ;;  %v460_v29 = vld [vmem:[%s3675_s10 + $0x40] sm:$0xff]  ;;  %v461_v30 = vld [vmem:[%s3675_s10 + $0x48] sm:$0xff]  ;;  %v3713_v45 = vsub.s32 0, %v497_v44  ;;  %v3718_v47 = vsub.s32 1, %v497_v44  ;;  %s5221_s28 = sld [smem:[#allocation29_spill]] }
  0x96   : > { %v471_v28 = vpack.c.bf16 %v459_v27, %v458_v26  ;;  %v472_v31 = vpack.c.bf16 %v461_v30, %v460_v29  ;;  %v462_v32 = vld [vmem:[%s3675_s10 + $0x50] sm:$0xff]  ;;  %v463_v33 = vld [vmem:[%s3675_s10 + $0x58] sm:$0xff]  ;;  %v464_v35 = vld [vmem:[%s3675_s10 + $0x60] sm:$0xff]  ;;  %s2431_s21 = scalar_lea.sflag [#allocation4], %s3669_s22  ;;  %s3319_s13 = scalar_lea.vmem %s5054_s30, 2048 }
  0x97   : > { %591 = vmatpush1.bf16.msra.mxu0 %v2805_v6  ;;  %v473_v34 = vpack.c.bf16 %v463_v33, %v462_v32  ;;  %v465_v36 = vld [vmem:[%s3675_s10 + $0x68] sm:$0xff]  ;;  %v466_v38 = vld [vmem:[%s3675_s10 + $0x70] sm:$0xff]  ;;  %v467_v39 = vld [vmem:[%s3675_s10 + $0x78] sm:$0xff]  ;;  %5152 = vst [vmem:[#allocation17_spill] sm:$0xff] %v3713_v45  ;;  %s5198_s10 = sld [smem:[#allocation27_spill]]  ;;  %p3320_p10 = scmp.ne.s32.totalorder %s5054_s30, %s3319_s13 }
  0x98   : > { %592 = vmatprep.subr.bf16.mxu0 %v2806_v7  ;;  %v474_v37 = vpack.c.bf16 %v465_v36, %v464_v35  ;;  %v475_v40 = vpack.c.bf16 %v467_v39, %v466_v38  ;;  %v2821_v41 = vld [vmem:[#allocation7 + $0x4] ss:$8 sps:$4 sm:$0xff]   ;;  %v2823_v42 = vld [vmem:[#allocation7] ss:$8 sps:$4 sm:$0xff]   ;;  %5153 = vst [vmem:[#allocation18_spill] sm:$0xff] %v3718_v47  ;;  %s3404_s27 = smov [#allocation10]  }
  0x99   : > { %1487 = vmatprep.subr.bf16.mxu1 %v2821_v41  ;;  %v492_v46 = vld [vmem:[%s5103_s2] sm:$0x3]  ;;  %v2824_v29 = vld [vmem:[#allocation7 + $0x14] ss:$8 sps:$4 sm:$0xff]   ;;  %v2826_v30 = vld [vmem:[#allocation7 + $0x10] ss:$8 sps:$4 sm:$0xff]   ;;  %p3321_p3 = pnand %p3320_p10, %p3618_p5 }
  0x9a   : > { %1488 = vmatpush1.bf16.msra.mxu1 %v2823_v42  ;;  %v3721_v48 = vrot.slane %v492_v46, %v3713_v45  ;;  %v3724_v49 = vrot.slane %v492_v46, %v3718_v47  ;;  %v2827_v38 = vld [vmem:[#allocation7 + $0x24] ss:$8 sps:$4 sm:$0xff]   ;;  %v2829_v42 = vld [vmem:[#allocation7 + $0x20] ss:$8 sps:$4 sm:$0xff]   ;;  %s3323_s24 = sshll.u32 %s3404_s27, 4  ;;  %s3324_s24 = int_to_ptr.vmem [resolvable:$false] %s3323_s24 }
  0x9b   : > { %593 = vmatpush1.bf16.msra.mxu0 %v2808_v8  ;;  %1489 = vmatprep.subr.bf16.mxu1 %v2824_v29  ;;  %s5052_s12 = scalar_lea.hbm %s5221_s28, %s2632_s14  ;;  %p3322_p7 = pneg %p3321_p3 }
  0x9c   : > { %594 = vmatprep.subr.bf16.mxu0 %v2809_v9  ;;  %p3326_p12 = scmp.lt.s32.totalorder %s5054_s30, %s3324_s24 }
  0x9e   : > { %1490 = vmatpush1.bf16.msra.mxu1 %v2826_v30  ;;  %v2839_v30 = vld [vmem:[#allocation7 + $0x64] ss:$8 sps:$4 sm:$0xff]  }
  0x9f   : > { %595 = vmatpush1.bf16.msra.mxu0 %v2811_v10  ;;  %1491 = vmatprep.subr.bf16.mxu1 %v2827_v38 }
  0xa0   : > { %596 = vmatprep.subr.bf16.mxu0 %v2812_v11 }
  0xa2   : > { %1492 = vmatpush1.bf16.msra.mxu1 %v2829_v42 }
  0xa3   : > { %597 = vmatpush1.bf16.msra.mxu0 %v2814_v12 }
  0xa4   : > { %598 = vmatprep.subr.bf16.mxu0 %v2815_v13 }
  0xa7   : > { %599 = vmatpush1.bf16.msra.mxu0 %v2817_v14 }
  0xa8   : > { %600 = vmatprep.subr.bf16.mxu0 %v2818_v15 }
  0xab   : > { %601 = vmatpush1.bf16.msra.mxu0 %v2820_v16 }
  0xae   : > { %619 = vmatmul.mubr.bf16.vlgmr.msra.gmra.mrb[0].mxu0 %v468_v19 }
  0xaf   : > { %628 = vmatprep.mubr.bf16.mxu0 %v3403_v0 }
  0xb6   : > { %629 = vmatmul.mubr.bf16.gmra.mrb[4].mxu0 %v469_v22 }
  0xb7   : > { %638 = vmatprep.mubr.bf16.mxu0 %v3403_v0 }
  0xbe   : > { %639 = vmatmul.mubr.bf16.gmra.mrb[8].mxu0 %v470_v25 }
  0xbf   : > { %648 = vmatprep.mubr.bf16.mxu0 %v3403_v0 }
  0xc6   : > { %649 = vmatmul.mubr.bf16.gmra.mrb[12].mxu0 %v471_v28 }
  0xc7   : > { %658 = vmatprep.mubr.bf16.mxu0 %v3403_v0 }
  0xce   : > { %659 = vmatmul.mubr.bf16.gmra.mrb[16].mxu0 %v472_v31 }
  0xcf   : > { %668 = vmatprep.mubr.bf16.mxu0 %v3403_v0 }
  0xd6   : > { %669 = vmatmul.mubr.bf16.gmra.mrb[20].mxu0 %v473_v34 }
  0xd7   : > { %678 = vmatprep.mubr.bf16.mxu0 %v3403_v0 }
  0xde   : > { %679 = vmatmul.mubr.bf16.gmra.mrb[24].mxu0 %v474_v37 }
  0xdf   : > { %688 = vmatprep.mubr.bf16.mxu0 %v3403_v0 }
  0xe6   : > { %689 = vmatmul.mubr.bf16.gmra.mrb[28].mxu0 %v475_v40 }
 0x181   : > { %v620_v50 = vpop.f32.mrb[0].mxu0 }
 0x182   : > { %v3727_v51 = vadd.f32 %v620_v50, %v3721_v48  ;;  %v622_v52 = vpop.f32.mrb[1].mxu0 }
 0x183   : > { %v3730_v53 = vadd.f32 %v622_v52, %v3724_v49  ;;  %v624_v54 = vpop.f32.mrb[2].mxu0 }
 0x184   : > { %v3733_v55 = vadd.f32 %v624_v54, %v3721_v48  ;;  %v626_v56 = vpop.f32.mrb[3].mxu0  ;;  %v763_v57 = vmul.f32 %v3727_v51, %v3727_v51 }
 0x185   : > { %v3738_v58 = vadd.f32 %v626_v56, %v3724_v49  ;;  %v699_v59 = vadd.f32 %v3730_v53, %v3727_v51  ;;  %v764_v60 = vmul.f32 %v3730_v53, %v3730_v53  ;;  %v2830_v56 = vld [vmem:[#allocation7 + $0x34] ss:$8 sps:$4 sm:$0xff]  }
 0x186   : > { %v765_v62 = vmul.f32 %v3733_v55, %v3733_v55  ;;  %1493 = vmatprep.subr.bf16.mxu1 %v2830_v56  ;;  %v2844_v56 = vld [vmem:[#allocation7 + $0x70] ss:$8 sps:$4 sm:$0xff]  }
 0x187   : > { %700 = vadd.xlane.f32.xlu0 %v699_v59  ;;  %v795_v61 = vadd.f32 %v764_v60, %v763_v57  ;;  %v766_v63 = vmul.f32 %v3738_v58, %v3738_v58  ;;  %v702_v1 = vadd.f32 %v3738_v58, %v3733_v55 }
 0x189   : > { %v630_v0 = vpop.f32.mrb[4].mxu0  ;;  %796 = vadd.xlane.f32.xlu1 %v795_v61  ;;  %v798_v6 = vadd.f32 %v766_v63, %v765_v62  ;;  %v2832_v61 = vld [vmem:[#allocation7 + $0x30] ss:$8 sps:$4 sm:$0xff]  }
 0x18a   : > { %v3751_v2 = vadd.f32 %v630_v0, %v3721_v48  ;;  %v632_v3 = vpop.f32.mrb[5].mxu0  ;;  %1494 = vmatpush1.bf16.msra.mxu1 %v2832_v61 }
 0x18b   : > { %v3754_v4 = vadd.f32 %v632_v3, %v3724_v49  ;;  %v634_v5 = vpop.f32.mrb[6].mxu0  ;;  %703 = vadd.xlane.f32.xlu0 %v702_v1  ;;  %v2833_v3 = vld [vmem:[#allocation7 + $0x44] ss:$8 sps:$4 sm:$0xff]  }
 0x18c   : > { %v3757_v7 = vadd.f32 %v634_v5, %v3721_v48  ;;  %v636_v8 = vpop.f32.mrb[7].mxu0  ;;  %v767_v11 = vmul.f32 %v3751_v2, %v3751_v2  ;;  %1495 = vmatprep.subr.bf16.mxu1 %v2833_v3 }
 0x18d   : > { %v3760_v9 = vadd.f32 %v636_v8, %v3724_v49  ;;  %799 = vadd.xlane.f32.xlu1 %v798_v6  ;;  %v705_v10 = vadd.f32 %v3754_v4, %v3751_v2  ;;  %v768_v12 = vmul.f32 %v3754_v4, %v3754_v4 }
 0x18e   : > { %v769_v14 = vmul.f32 %v3757_v7, %v3757_v7 }
 0x18f   : > { %706 = vadd.xlane.f32.xlu0 %v705_v10  ;;  %v708_v13 = vadd.f32 %v3760_v9, %v3757_v7  ;;  %v770_v15 = vmul.f32 %v3760_v9, %v3760_v9  ;;  %v801_v17 = vadd.f32 %v768_v12, %v767_v11  ;;  %v2835_v10 = vld [vmem:[#allocation7 + $0x40] ss:$8 sps:$4 sm:$0xff]  }
 0x190   : > { %1496 = vmatpush1.bf16.msra.mxu1 %v2835_v10 }
 0x191   : > { %v640_v16 = vpop.f32.mrb[8].mxu0  ;;  %709 = vadd.xlane.f32.xlu1 %v708_v13  ;;  %v804_v22 = vadd.f32 %v770_v15, %v769_v14 }
 0x192   : > { %v3775_v18 = vadd.f32 %v640_v16, %v3721_v48  ;;  %v642_v19 = vpop.f32.mrb[9].mxu0 }
 0x193   : > { %v3778_v20 = vadd.f32 %v642_v19, %v3724_v49  ;;  %v644_v21 = vpop.f32.mrb[10].mxu0  ;;  %802 = vadd.xlane.f32.xlu0 %v801_v17  ;;  %v2836_v17 = vld [vmem:[#allocation7 + $0x54] ss:$8 sps:$4 sm:$0xff]  }
 0x194   : > { %v3781_v23 = vadd.f32 %v644_v21, %v3721_v48  ;;  %v646_v24 = vpop.f32.mrb[11].mxu0  ;;  %v771_v27 = vmul.f32 %v3775_v18, %v3775_v18  ;;  %1497 = vmatprep.subr.bf16.mxu1 %v2836_v17  ;;  %v2848_v17 = vld [vmem:[#allocation7 + $0x94] ss:$8 sps:$4 sm:$0xff]  }
 0x195   : > { %v3784_v25 = vadd.f32 %v646_v24, %v3724_v49  ;;  %805 = vadd.xlane.f32.xlu1 %v804_v22  ;;  %v711_v26 = vadd.f32 %v3778_v20, %v3775_v18  ;;  %v772_v28 = vmul.f32 %v3778_v20, %v3778_v20  ;;  %v2838_v24 = vld [vmem:[#allocation7 + $0x50] ss:$8 sps:$4 sm:$0xff]  }
 0x196   : > { %v773_v32 = vmul.f32 %v3781_v23, %v3781_v23  ;;  %1498 = vmatpush1.bf16.msra.mxu1 %v2838_v24  ;;  %v2850_v24 = vld [vmem:[#allocation7 + $0x90] ss:$8 sps:$4 sm:$0xff]  }
 0x197   : > { %712 = vadd.xlane.f32.xlu0 %v711_v26  ;;  %v714_v31 = vadd.f32 %v3784_v25, %v3781_v23  ;;  %v774_v33 = vmul.f32 %v3784_v25, %v3784_v25  ;;  %v807_v35 = vadd.f32 %v772_v28, %v771_v27  ;;  %1499 = vmatprep.subr.bf16.mxu1 %v2839_v30 }
 0x199   : > { %v650_v34 = vpop.f32.mrb[12].mxu0  ;;  %715 = vadd.xlane.f32.xlu1 %v714_v31  ;;  %v810_v41 = vadd.f32 %v774_v33, %v773_v32 }
 0x19a   : > { %v3799_v36 = vadd.f32 %v650_v34, %v3721_v48  ;;  %v652_v37 = vpop.f32.mrb[13].mxu0  ;;  %v2841_v34 = vld [vmem:[#allocation7 + $0x60] ss:$8 sps:$4 sm:$0xff]  }
 0x19b   : > { %v3802_v39 = vadd.f32 %v652_v37, %v3724_v49  ;;  %v654_v40 = vpop.f32.mrb[14].mxu0  ;;  %808 = vadd.xlane.f32.xlu0 %v807_v35  ;;  %1500 = vmatpush1.bf16.msra.mxu1 %v2841_v34 }
 0x19c   : > { %v3805_v43 = vadd.f32 %v654_v40, %v3721_v48  ;;  %v656_v44 = vpop.f32.mrb[15].mxu0  ;;  %v775_v46 = vmul.f32 %v3799_v36, %v3799_v36 }
 0x19d   : > { %v3810_v50 = vadd.f32 %v656_v44, %v3724_v49  ;;  %811 = vadd.xlane.f32.xlu1 %v810_v41  ;;  %v717_v52 = vadd.f32 %v3802_v39, %v3799_v36  ;;  %v776_v54 = vmul.f32 %v3802_v39, %v3802_v39  ;;  %v2842_v44 = vld [vmem:[#allocation7 + $0x74] ss:$8 sps:$4 sm:$0xff]  }
 0x19e   : > { %v777_v59 = vmul.f32 %v3805_v43, %v3805_v43  ;;  %1501 = vmatprep.subr.bf16.mxu1 %v2842_v44 }
 0x19f   : > { %718 = vadd.xlane.f32.xlu0 %v717_v52  ;;  %v720_v57 = vadd.f32 %v3810_v50, %v3805_v43  ;;  %v778_v60 = vmul.f32 %v3810_v50, %v3810_v50  ;;  %v813_v63 = vadd.f32 %v776_v54, %v775_v46  ;;  %1502 = vmatpush1.bf16.msra.mxu1 %v2844_v56  ;;  %v2854_v56 = vld [vmem:[#allocation7 + $0xb4] ss:$8 sps:$4 sm:$0xff]  }
 0x1a1   : > { %v660_v62 = vpop.f32.mrb[16].mxu0  ;;  %721 = vadd.xlane.f32.xlu1 %v720_v57  ;;  %v816_v8 = vadd.f32 %v778_v60, %v777_v59 }
 0x1a2   : > { %v3823_v0 = vadd.f32 %v660_v62, %v3721_v48  ;;  %v662_v1 = vpop.f32.mrb[17].mxu0  ;;  %v2845_v62 = vld [vmem:[#allocation7 + $0x84] ss:$8 sps:$4 sm:$0xff]  }
 0x1a3   : > { %v3826_v5 = vadd.f32 %v662_v1, %v3724_v49  ;;  %v664_v6 = vpop.f32.mrb[18].mxu0  ;;  %814 = vadd.xlane.f32.xlu0 %v813_v63  ;;  %1503 = vmatprep.subr.bf16.mxu1 %v2845_v62  ;;  %v2857_v62 = vld [vmem:[#allocation7 + $0xc4] ss:$8 sps:$4 sm:$0xff]  }
 0x1a4   : > { %5154 = vst [vmem:[#allocation19_spill] sm:$0xff] %v3823_v0  ;;  %v3829_v11 = vadd.f32 %v664_v6, %v3721_v48  ;;  %v666_v12 = vpop.f32.mrb[19].mxu0  ;;  %v779_v13 = vmul.f32 %v3823_v0, %v3823_v0  ;;  %v2847_v6 = vld [vmem:[#allocation7 + $0x80] ss:$8 sps:$4 sm:$0xff]  }
 0x1a5   : > { %v3834_v14 = vadd.f32 %v666_v12, %v3724_v49  ;;  %817 = vadd.xlane.f32.xlu1 %v816_v8  ;;  %v723_v15 = vadd.f32 %v3826_v5, %v3823_v0  ;;  %v780_v16 = vmul.f32 %v3826_v5, %v3826_v5  ;;  %1504 = vmatpush1.bf16.msra.mxu1 %v2847_v6  ;;  %v2860_v6 = vld [vmem:[#allocation7 + $0xd4] ss:$8 sps:$4 sm:$0xff]  }
 0x1a6   : > { %5155 = vst [vmem:[#allocation20_spill] sm:$0xff] %v3829_v11  ;;  %v781_v21 = vmul.f32 %v3829_v11, %v3829_v11  ;;  %1505 = vmatprep.subr.bf16.mxu1 %v2848_v17  ;;  %v2868_v17 = vld [vmem:[#allocation7 + $0xf0] ss:$8 sps:$4 sm:$0xff]  }
 0x1a7   : > { %724 = vadd.xlane.f32.xlu0 %v723_v15  ;;  %v726_v19 = vadd.f32 %v3834_v14, %v3829_v11  ;;  %v782_v22 = vmul.f32 %v3834_v14, %v3834_v14  ;;  %v819_v27 = vadd.f32 %v780_v16, %v779_v13 }
 0x1a9   : > { %v670_v26 = vpop.f32.mrb[20].mxu0  ;;  %727 = vadd.xlane.f32.xlu1 %v726_v19  ;;  %v822_v33 = vadd.f32 %v782_v22, %v781_v21  ;;  %1506 = vmatpush1.bf16.msra.mxu1 %v2850_v24 }
 0x1aa   : > { %v3847_v28 = vadd.f32 %v670_v26, %v3721_v48  ;;  %v672_v29 = vpop.f32.mrb[21].mxu0 }
 0x1ab   : > { %v3850_v31 = vadd.f32 %v672_v29, %v3724_v49  ;;  %v674_v32 = vpop.f32.mrb[22].mxu0  ;;  %820 = vadd.xlane.f32.xlu0 %v819_v27 }
 0x1ac   : > { %5156 = vst [vmem:[#allocation21_spill] sm:$0xff] %v3847_v28  ;;  %v3853_v35 = vadd.f32 %v674_v32, %v3721_v48  ;;  %v676_v37 = vpop.f32.mrb[23].mxu0  ;;  %v783_v38 = vmul.f32 %v3847_v28, %v3847_v28  ;;  %v2851_v32 = vld [vmem:[#allocation7 + $0xa4] ss:$8 sps:$4 sm:$0xff]  }
 0x1ad   : > { %v3858_v40 = vadd.f32 %v676_v37, %v3724_v49  ;;  %823 = vadd.xlane.f32.xlu1 %v822_v33  ;;  %v729_v41 = vadd.f32 %v3850_v31, %v3847_v28  ;;  %v784_v42 = vmul.f32 %v3850_v31, %v3850_v31  ;;  %1507 = vmatprep.subr.bf16.mxu1 %v2851_v32 }
 0x1ae   : > { %5157 = vst [vmem:[#allocation22_spill] sm:$0xff] %v3853_v35  ;;  %v785_v52 = vmul.f32 %v3853_v35, %v3853_v35 }
 0x1af   : > { %730 = vadd.xlane.f32.xlu0 %v729_v41  ;;  %v732_v46 = vadd.f32 %v3858_v40, %v3853_v35  ;;  %v786_v54 = vmul.f32 %v3858_v40, %v3858_v40  ;;  %v825_v59 = vadd.f32 %v784_v42, %v783_v38  ;;  %v2853_v38 = vld [vmem:[#allocation7 + $0xa0] ss:$8 sps:$4 sm:$0xff]  }
 0x1b0   : > { %1508 = vmatpush1.bf16.msra.mxu1 %v2853_v38 }
 0x1b1   : > { %v680_v57 = vpop.f32.mrb[24].mxu0  ;;  %733 = vadd.xlane.f32.xlu1 %v732_v46  ;;  %v828_v3 = vadd.f32 %v786_v54, %v785_v52  ;;  %1509 = vmatprep.subr.bf16.mxu1 %v2854_v56 }
 0x1b2   : > { %v3871_v60 = vadd.f32 %v680_v57, %v3721_v48  ;;  %v682_v61 = vpop.f32.mrb[25].mxu0 }
 0x1b3   : > { %v3874_v63 = vadd.f32 %v682_v61, %v3724_v49  ;;  %v684_v1 = vpop.f32.mrb[26].mxu0  ;;  %826 = vadd.xlane.f32.xlu0 %v825_v59  ;;  %v2856_v59 = vld [vmem:[#allocation7 + $0xb0] ss:$8 sps:$4 sm:$0xff]  }
 0x1b4   : > { %5158 = vst [vmem:[#allocation23_spill] sm:$0xff] %v3871_v60  ;;  %v3877_v8 = vadd.f32 %v684_v1, %v3721_v48  ;;  %v686_v10 = vpop.f32.mrb[27].mxu0  ;;  %v787_v12 = vmul.f32 %v3871_v60, %v3871_v60  ;;  %1510 = vmatpush1.bf16.msra.mxu1 %v2856_v59 }
 0x1b5   : > { %v3882_v13 = vadd.f32 %v686_v10, %v3724_v49  ;;  %829 = vadd.xlane.f32.xlu1 %v828_v3  ;;  %v735_v15 = vadd.f32 %v3874_v63, %v3871_v60  ;;  %v788_v16 = vmul.f32 %v3874_v63, %v3874_v63  ;;  %v2859_v3 = vld [vmem:[#allocation7 + $0xc0] ss:$8 sps:$4 sm:$0xff]   ;;  %1511 = vmatprep.subr.bf16.mxu1 %v2857_v62  ;;  %v2862_v10 = vld [vmem:[#allocation7 + $0xd0] ss:$8 sps:$4 sm:$0xff]  }
 0x1b6   : > { %5159 = vst [vmem:[#allocation24_spill] sm:$0xff] %v3877_v8  ;;  %v789_v21 = vmul.f32 %v3877_v8, %v3877_v8 }
 0x1b7   : > { %736 = vadd.xlane.f32.xlu0 %v735_v15  ;;  %v738_v19 = vadd.f32 %v3882_v13, %v3877_v8  ;;  %v790_v22 = vmul.f32 %v3882_v13, %v3882_v13  ;;  %v831_v27 = vadd.f32 %v788_v16, %v787_v12  ;;  %v2863_v12 = vld [vmem:[#allocation7 + $0xe4] ss:$8 sps:$4 sm:$0xff]   ;;  %v2865_v15 = vld [vmem:[#allocation7 + $0xe0] ss:$8 sps:$4 sm:$0xff]   ;;  %v2866_v16 = vld [vmem:[#allocation7 + $0xf4] ss:$8 sps:$4 sm:$0xff]  }
 0x1b8   : > { %1512 = vmatpush1.bf16.msra.mxu1 %v2859_v3 }
 0x1b9   : > { %v690_v26 = vpop.f32.mrb[28].mxu0  ;;  %739 = vadd.xlane.f32.xlu1 %v738_v19  ;;  %v834_v37 = vadd.f32 %v790_v22, %v789_v21  ;;  %1513 = vmatprep.subr.bf16.mxu1 %v2860_v6 }
 0x1ba   : > { %v3895_v29 = vadd.f32 %v690_v26, %v3721_v48  ;;  %v692_v30 = vpop.f32.mrb[29].mxu0 }
 0x1bb   : > { %v3898_v33 = vadd.f32 %v692_v30, %v3724_v49  ;;  %v694_v34 = vpop.f32.mrb[30].mxu0  ;;  %832 = vadd.xlane.f32.xlu0 %v831_v27 }
 0x1bc   : > { %v3901_v41 = vadd.f32 %v694_v34, %v3721_v48  ;;  %v696_v42 = vpop.f32.mrb[31].mxu0  ;;  %v791_v44 = vmul.f32 %v3895_v29, %v3895_v29  ;;  %1514 = vmatpush1.bf16.msra.mxu1 %v2862_v10 }
 0x1bd   : > { %v3906_v46 = vadd.f32 %v696_v42, %v3724_v49  ;;  %835 = vadd.xlane.f32.xlu1 %v834_v37  ;;  %v741_v52 = vadd.f32 %v3898_v33, %v3895_v29  ;;  %v792_v54 = vmul.f32 %v3898_v33, %v3898_v33  ;;  %1515 = vmatprep.subr.bf16.mxu1 %v2863_v12  ;;  %v494_v12 = vld [vmem:[%s5105_s4] sm:$0x3] }
 0x1be   : > { %v793_v57 = vmul.f32 %v3901_v41, %v3901_v41 }
 0x1bf   : > { %742 = vadd.xlane.f32.xlu0 %v741_v52  ;;  %v744_v48 = vadd.f32 %v3906_v46, %v3901_v41  ;;  %v794_v49 = vmul.f32 %v3906_v46, %v3906_v46  ;;  %v837_v61 = vadd.f32 %v792_v54, %v791_v44 }
 0x1c0   : > { %1516 = vmatpush1.bf16.msra.mxu1 %v2865_v15 }
 0x1c1   : > { %745 = vadd.xlane.f32.xlu1 %v744_v48  ;;  %v840_v1 = vadd.f32 %v794_v49, %v793_v57  ;;  %1517 = vmatprep.subr.bf16.mxu1 %v2866_v16 }
 0x1c3   : > { %838 = vadd.xlane.f32.xlu0 %v837_v61 }
 0x1c4   : > { %1518 = vmatpush1.bf16.msra.mxu1 %v2868_v17 }
 0x1c5   : > { %841 = vadd.xlane.f32.xlu1 %v840_v1  ;;  %v493_v1 = vld [vmem:[%s5104_s3] sm:$0x3] }
 0x214   : > { %v701_v19 = vpop.xlane.xlu0 %700 }
 0x215   : > { %v747_v21 = vmul.f32 0.00390625, %v701_v19 }
 0x216   : > { %v797_v22 = vpop.xlane.xlu1 %796 }
 0x217   : > { %v843_v24 = vmul.f32 0.00390625, %v797_v22  ;;  %v859_v26 = vmul.f32 %v747_v21, %v747_v21  ;;  %v3939_v22 = vrot.slane %v493_v1, %v3713_v45 }
 0x218   : > { %v704_v27 = vpop.xlane.xlu0 %703 }
 0x219   : > { %v875_v30 = vsub.f32 %v843_v24, %v859_v26  ;;  %v3918_v32 = vmul.f32 0.00390625, %v704_v27  ;;  %v891_v24 = vsub.f32 %v3727_v51, %v747_v21  ;;  %v892_v26 = vsub.f32 %v3730_v53, %v747_v21 }
 0x21a   : > { %v800_v34 = vpop.xlane.xlu1 %799 }
 0x21b   : > { %v923_v37 = vadd.f32 1e-05, %v875_v30  ;;  %v844_v38 = vmul.f32 0.00390625, %v800_v34  ;;  %v860_v42 = vmul.f32 %v3918_v32, %v3918_v32  ;;  %v3944_v30 = vrot.slane %v493_v1, %v3718_v47 }
 0x21c   : > { %v707_v44 = vpop.xlane.xlu0 %706  ;;  %v3947_v34 = vrot.slane %v494_v12, %v3713_v45  ;;  %v894_v51 = vsub.f32 %v3738_v58, %v3918_v32 }
 0x21d   : > { %2885 = vrsqrt.f32 %v923_v37  ;;  %v3922_v52 = vmul.f32 0.00390625, %v707_v44  ;;  %v876_v54 = vsub.f32 %v844_v38, %v860_v42  ;;  %v893_v38 = vsub.f32 %v3733_v55, %v3918_v32 }
 0x21e   : > { %v710_v56 = vpop.xlane.xlu1 %709  ;;  %v3952_v44 = vrot.slane %v494_v12, %v3718_v47 }
 0x21f   : > { %v3924_v48 = vmul.f32 0.00390625, %v710_v56  ;;  %v924_v57 = vadd.f32 1e-05, %v876_v54  ;;  %v861_v59 = vmul.f32 %v3922_v52, %v3922_v52 }
 0x220   : > { %v803_v49 = vpop.xlane.xlu0 %802 }
 0x221   : > { %v845_v61 = vmul.f32 0.00390625, %v803_v49  ;;  %2887 = vrsqrt.f32 %v924_v57  ;;  %v862_v6 = vmul.f32 %v3924_v48, %v3924_v48  ;;  %v898_v58 = vsub.f32 %v3760_v9, %v3924_v48 }
 0x222   : > { %v806_v62 = vpop.xlane.xlu1 %805 }
 0x223   : > { %v877_v3 = vsub.f32 %v845_v61, %v861_v59  ;;  %v846_v10 = vmul.f32 0.00390625, %v806_v62  ;;  %v896_v59 = vsub.f32 %v3754_v4, %v3922_v52 }
 0x224   : > { %v713_v15 = vpop.xlane.xlu0 %712 }
 0x225   : > { %v925_v16 = vadd.f32 1e-05, %v877_v3  ;;  %v878_v17 = vsub.f32 %v846_v10, %v862_v6  ;;  %v3936_v19 = vmul.f32 0.00390625, %v713_v15 }
 0x226   : > { %v716_v27 = vpop.xlane.xlu1 %715 }
 0x227   : > { %v2886_v37 = vpop.eup %2885  ;;  %2889 = vrsqrt.f32 %v925_v16  ;;  %v926_v42 = vadd.f32 1e-05, %v878_v17  ;;  %v3956_v53 = vmul.f32 0.00390625, %v716_v27  ;;  %v863_v55 = vmul.f32 %v3936_v19, %v3936_v19 }
 0x228   : > { %v809_v21 = vpop.xlane.xlu0 %808  ;;  %v956_v54 = vmul.f32 %v2886_v37, %v892_v26  ;;  %v955_v56 = vmul.f32 %v2886_v37, %v891_v24 }
 0x229   : > { %2891 = vrsqrt.f32 %v926_v42  ;;  %v847_v49 = vmul.f32 0.00390625, %v809_v21  ;;  %v864_v3 = vmul.f32 %v3956_v53, %v3956_v53 }
 0x22a   : > { %v812_v32 = vpop.xlane.xlu1 %811  ;;  %v999_v62 = vmul.f32 %v3944_v30, %v956_v54  ;;  %v998_v10 = vmul.f32 %v3939_v22, %v955_v56 }
 0x22b   : > { %v879_v1 = vsub.f32 %v847_v49, %v863_v55  ;;  %v848_v6 = vmul.f32 0.00390625, %v812_v32  ;;  %v2888_v12 = vpop.eup %2887 }
 0x22c   : > { %v719_v16 = vpop.xlane.xlu0 %718  ;;  %v3979_v17 = vadd.f32 %v3952_v44, %v999_v62  ;;  %v958_v37 = vmul.f32 %v2888_v12, %v894_v51  ;;  %v957_v56 = vmul.f32 %v2888_v12, %v893_v38  ;;  %v3987_v55 = vadd.f32 %v3947_v34, %v998_v10 }
 0x22d   : > { %v927_v24 = vadd.f32 1e-05, %v879_v1  ;;  %v880_v26 = vsub.f32 %v848_v6, %v864_v3  ;;  %v3981_v27 = vmul.f32 0.00390625, %v719_v16 }
 0x22e   : > { %v722_v21 = vpop.xlane.xlu1 %721  ;;  %v1074_v54 = vsub.f32 0.0, %v3979_v17  ;;  %v1001_v6 = vmul.f32 %v3944_v30, %v958_v37  ;;  %v1000_v16 = vmul.f32 %v3939_v22, %v957_v56 }
 0x22f   : > { %2893 = vrsqrt.f32 %v927_v24  ;;  %v928_v49 = vadd.f32 1e-05, %v880_v26  ;;  %v3993_v1 = vmul.f32 0.00390625, %v722_v21  ;;  %v865_v51 = vmul.f32 %v3981_v27, %v3981_v27 }
 0x230   : > { %v815_v3 = vpop.xlane.xlu0 %814  ;;  %v1107_v38 = vmul.f32 1.442695, %v1074_v54  ;;  %v1073_v24 = vsub.f32 0.0, %v3987_v55  ;;  %v4007_v37 = vadd.f32 %v3952_v44, %v1001_v6  ;;  %v4010_v56 = vadd.f32 %v3947_v34, %v1000_v16 }
 0x231   : > { %v2890_v12 = vpop.eup %2889  ;;  %2895 = vrsqrt.f32 %v928_v49  ;;  %v849_v10 = vmul.f32 0.00390625, %v815_v3  ;;  %v866_v32 = vmul.f32 %v3993_v1, %v3993_v1 }
 0x232   : > { %v818_v62 = vpop.xlane.xlu1 %817  ;;  %2897 = vpow2.f32 %v1107_v38  ;;  %v1076_v26 = vsub.f32 0.0, %v4007_v37  ;;  %v1105_v4 = vmul.f32 1.442695, %v1073_v24  ;;  %v960_v42 = vmul.f32 %v2890_v12, %v896_v59 }
 0x233   : > { %v2892_v54 = vpop.eup %2891  ;;  %v881_v49 = vsub.f32 %v849_v10, %v865_v51  ;;  %v850_v3 = vmul.f32 0.00390625, %v818_v62  ;;  %v1075_v6 = vsub.f32 0.0, %v4010_v56 }
 0x234   : > { %v725_v9 = vpop.xlane.xlu0 %724  ;;  %v962_v21 = vmul.f32 %v2892_v54, %v898_v58  ;;  %v1111_v45 = vmul.f32 1.442695, %v1076_v26  ;;  %2899 = vpow2.f32 %v1105_v4  ;;  %v1003_v62 = vmul.f32 %v3944_v30, %v960_v42 }
 0x235   : > { %v929_v15 = vadd.f32 1e-05, %v881_v49  ;;  %v882_v61 = vsub.f32 %v850_v3, %v866_v32  ;;  %v4013_v57 = vmul.f32 0.00390625, %v725_v9  ;;  %v1109_v4 = vmul.f32 1.442695, %v1075_v6 }
 0x236   : > { %v728_v47 = vpop.xlane.xlu1 %727  ;;  %v1005_v51 = vmul.f32 %v3944_v30, %v962_v21 }
 0x237   : > { %2901 = vrsqrt.f32 %v929_v15  ;;  %v930_v38 = vadd.f32 1e-05, %v882_v61  ;;  %v4022_v58 = vmul.f32 0.00390625, %v728_v47  ;;  %v867_v9 = vmul.f32 %v4013_v57, %v4013_v57 }
 0x238   : > { %v821_v32 = vpop.xlane.xlu0 %820  ;;  %2903 = vpow2.f32 %v1111_v45  ;;  %v4029_v61 = vadd.f32 %v3952_v44, %v1003_v62  ;;  %v4032_v15 = vadd.f32 %v3952_v44, %v1005_v51  ;;  %v5161_v47 = vsub.f32 %v3757_v7, %v3924_v48 }
 0x239   : > { %v4026_v16 = vpop.eup %2893  ;;  %2905 = vrsqrt.f32 %v930_v38  ;;  %v851_v42 = vmul.f32 0.00390625, %v821_v32  ;;  %v868_v45 = vmul.f32 %v4022_v58, %v4022_v58  ;;  %v5160_v38 = vsub.f32 %v3751_v2, %v3922_v52 }
 0x23a   : > { %v824_v26 = vpop.xlane.xlu1 %823  ;;  %2907 = vpow2.f32 %v1109_v4  ;;  %v1078_v6 = vsub.f32 0.0, %v4029_v61  ;;  %v1080_v62 = vsub.f32 0.0, %v4032_v15  ;;  %v961_v10 = vmul.f32 %v2892_v54, %v5161_v47 }
 0x23b   : > { %v4040_v21 = vpop.eup %2895  ;;  %v883_v49 = vsub.f32 %v851_v42, %v867_v9  ;;  %v852_v3 = vmul.f32 0.00390625, %v824_v26  ;;  %v959_v32 = vmul.f32 %v2890_v12, %v5160_v38  ;;  %v5162_v4 = vsub.f32 %v3778_v20, %v3936_v19 }
 0x23c   : > { %v731_v51 = vpop.xlane.xlu0 %730  ;;  %v5163_v9 = vsub.f32 %v3784_v25, %v3956_v53  ;;  %v2898_v26 = vpop.eup %2897  ;;  %v1115_v2 = vmul.f32 1.442695, %v1078_v6  ;;  %v1119_v7 = vmul.f32 1.442695, %v1080_v62  ;;  %v1004_v20 = vmul.f32 %v3939_v22, %v961_v10 }
 0x23d   : > { %v964_v24 = vmul.f32 %v4026_v16, %v5162_v4  ;;  %v931_v59 = vadd.f32 1e-05, %v883_v49  ;;  %v884_v11 = vsub.f32 %v852_v3, %v868_v45  ;;  %v4058_v0 = vmul.f32 0.00390625, %v731_v51 }
 0x23e   : > { %v966_v42 = vmul.f32 %v4040_v21, %v5163_v9  ;;  %v734_v52 = vpop.xlane.xlu1 %733  ;;  %v1170_v12 = vadd.f32 1.0, %v2898_v26  ;;  %v1002_v48 = vmul.f32 %v3939_v22, %v959_v32  ;;  %v2900_v49 = vpop.eup %2899  ;;  %v4076_v51 = vadd.f32 %v3947_v34, %v1004_v20 }
 0x23f   : > { %2909 = vrsqrt.f32 %v931_v59  ;;  %v932_v54 = vadd.f32 1e-05, %v884_v11  ;;  %v4066_v45 = vmul.f32 0.00390625, %v734_v52  ;;  %v869_v3 = vmul.f32 %v4058_v0, %v4058_v0 }
 0x240   : > { %v827_v6 = vpop.xlane.xlu0 %826  ;;  %2911 = vrcp.f32 %v1170_v12  ;;  %v4071_v62 = vadd.f32 %v3947_v34, %v1002_v48  ;;  %v1169_v59 = vadd.f32 1.0, %v2900_v49  ;;  %v1079_v32 = vsub.f32 0.0, %v4076_v51 }
 0x241   : > { %v4073_v10 = vpop.eup %2901  ;;  %2913 = vrsqrt.f32 %v932_v54  ;;  %v853_v11 = vmul.f32 0.00390625, %v827_v6  ;;  %v870_v9 = vmul.f32 %v4066_v45, %v4066_v45  ;;  %v1007_v25 = vmul.f32 %v3944_v30, %v964_v24 }
 0x242   : > { %v2904_v38 = vpop.eup %2903  ;;  %v830_v26 = vpop.xlane.xlu1 %829  ;;  %2915 = vpow2.f32 %v1115_v2  ;;  %v1077_v6 = vsub.f32 0.0, %v4071_v62 }
 0x243   : > { %v4084_v52 = vpop.eup %2905  ;;  %v885_v12 = vsub.f32 %v853_v11, %v869_v3  ;;  %v854_v48 = vmul.f32 0.00390625, %v830_v26  ;;  %v1172_v54 = vadd.f32 1.0, %v2904_v38  ;;  %2917 = vrcp.f32 %v1169_v59 }
 0x244   : > { %v2908_v20 = vpop.eup %2907  ;;  %v737_v49 = vpop.xlane.xlu0 %736  ;;  %2919 = vpow2.f32 %v1119_v7  ;;  %v1113_v3 = vmul.f32 1.442695, %v1077_v6  ;;  %v1117_v11 = vmul.f32 1.442695, %v1079_v32  ;;  %v1009_v59 = vmul.f32 %v3944_v30, %v966_v42 }
 0x245   : > { %v933_v4 = vadd.f32 1e-05, %v885_v12  ;;  %v886_v47 = vsub.f32 %v854_v48, %v870_v9  ;;  %v4089_v35 = vmul.f32 0.00390625, %v737_v49  ;;  %2921 = vrcp.f32 %v1172_v54 }
 0x246   : > { %v740_v2 = vpop.xlane.xlu1 %739  ;;  %v1171_v28 = vadd.f32 1.0, %v2908_v20  ;;  %v4101_v48 = vadd.f32 %v3952_v44, %v1007_v25  ;;  %v5167_v49 = vsub.f32 %v3781_v23, %v3956_v53 }
 0x247   : > { %2923 = vrsqrt.f32 %v933_v4  ;;  %v934_v38 = vadd.f32 1e-05, %v886_v47  ;;  %v4096_v24 = vmul.f32 0.00390625, %v740_v2  ;;  %v871_v9 = vmul.f32 %v4089_v35, %v4089_v35 }
 0x248   : > { %v833_v12 = vpop.xlane.xlu0 %832  ;;  %2925 = vrcp.f32 %v1171_v28  ;;  %5164 = vst [vmem:[#allocation25_spill] sm:$0xff] %v4101_v48  ;;  %v4106_v47 = vadd.f32 %v3952_v44, %v1009_v59  ;;  %v5166_v4 = vsub.f32 %v3775_v18, %v3936_v19  ;;  %v965_v7 = vmul.f32 %v4040_v21, %v5167_v49 }
 0x249   : > { %v4103_v32 = vpop.eup %2909  ;;  %2927 = vrsqrt.f32 %v934_v38  ;;  %v855_v42 = vmul.f32 0.00390625, %v833_v12  ;;  %v872_v25 = vmul.f32 %v4096_v24, %v4096_v24  ;;  %v1082_v12 = vsub.f32 0.0, %v4101_v48 }
 0x24a   : > { %5165 = vst [vmem:[#allocation26_spill] sm:$0xff] %v4106_v47  ;;  %v963_v54 = vmul.f32 %v4026_v16, %v5166_v4  ;;  %v2912_v20 = vpop.eup %2911  ;;  %v836_v6 = vpop.xlane.xlu1 %835  ;;  %2929 = vpow2.f32 %v1113_v3  ;;  %v1084_v4 = vsub.f32 0.0, %v4106_v47  ;;  %v1008_v47 = vmul.f32 %v3939_v22, %v965_v7 }
 0x24b   : > { %v4118_v2 = vpop.eup %2913  ;;  %v887_v59 = vsub.f32 %v855_v42, %v871_v9  ;;  %v856_v38 = vmul.f32 0.00390625, %v836_v6  ;;  %v1234_v18 = vmul.f32 %v2912_v20, %v3979_v17  ;;  %2931 = vpow2.f32 %v1117_v11 }
 0x24c   : > { %v2916_v19 = vpop.eup %2915  ;;  %v743_v16 = vpop.xlane.xlu0 %742  ;;  %v1006_v3 = vmul.f32 %v3939_v22, %v963_v54  ;;  %v1123_v8 = vmul.f32 1.442695, %v1082_v12  ;;  %v1127_v60 = vmul.f32 1.442695, %v1084_v4 }
 0x24d   : > { %v2918_v28 = vpop.eup %2917  ;;  %v935_v26 = vadd.f32 1e-05, %v887_v59  ;;  %v888_v9 = vsub.f32 %v856_v38, %v872_v25  ;;  %v4128_v42 = vmul.f32 0.00390625, %v743_v16  ;;  %v1174_v17 = vadd.f32 1.0, %v2916_v19 }
 0x24e   : > { %v2920_v11 = vpop.eup %2919  ;;  %v746_v20 = vpop.xlane.xlu1 %745  ;;  %v1233_v6 = vmul.f32 %v2918_v28, %v3987_v55  ;;  %v4147_v38 = vadd.f32 %v3947_v34, %v1008_v47  ;;  %v5168_v16 = vsub.f32 %v3802_v39, %v3981_v27 }
 0x24f   : > { %v2922_v48 = vpop.eup %2921  ;;  %2933 = vrsqrt.f32 %v935_v26  ;;  %v936_v23 = vadd.f32 1e-05, %v888_v9  ;;  %v920_v21 = vsub.f32 %v3898_v33, %v4128_v42  ;;  %v4136_v54 = vmul.f32 0.00390625, %v746_v20 }
 0x250   : > { %v873_v49 = vmul.f32 %v4128_v42, %v4128_v42  ;;  %v839_v25 = vpop.xlane.xlu0 %838  ;;  %v1236_v55 = vmul.f32 %v2922_v48, %v4007_v37  ;;  %v1176_v28 = vadd.f32 1.0, %v2920_v11  ;;  %v4144_v26 = vadd.f32 %v3947_v34, %v1006_v3 }
 0x251   : > { %v4141_v59 = vpop.eup %2923  ;;  %2935 = vrsqrt.f32 %v936_v23  ;;  %v857_v7 = vmul.f32 0.00390625, %v839_v25  ;;  %v874_v37 = vmul.f32 %v4136_v54, %v4136_v54  ;;  %v1083_v25 = vsub.f32 0.0, %v4147_v38 }
 0x252   : > { %v2926_v19 = vpop.eup %2925  ;;  %v842_v48 = vpop.xlane.xlu1 %841  ;;  %v1266_v4 = vpack.c.bf16 %v1236_v55, %v1234_v18  ;;  %2937 = vrcp.f32 %v1174_v17  ;;  %v1081_v23 = vsub.f32 0.0, %v4144_v26  ;;  %v968_v53 = vmul.f32 %v4073_v10, %v5168_v16 }
 0x253   : > { %v4155_v9 = vpop.eup %2927  ;;  %v889_v11 = vsub.f32 %v857_v7, %v873_v49  ;;  %v858_v3 = vmul.f32 0.00390625, %v842_v48  ;;  %v1235_v20 = vmul.f32 %v2926_v19, %v4010_v56  ;;  %2939 = vrcp.f32 %v1176_v28 }
 0x254   : > { %v2930_v47 = vpop.eup %2929  ;;  %1519 = vmatprep.mubr.bf16.mxu1 %v1266_v4  ;;  %2941 = vpow2.f32 %v1123_v8  ;;  %v1121_v56 = vmul.f32 1.442695, %v1081_v23  ;;  %v1125_v17 = vmul.f32 1.442695, %v1083_v25  ;;  %v5169_v19 = vsub.f32 %v3810_v50, %v3993_v1 }
 0x255   : > { %v2932_v18 = vpop.eup %2931  ;;  %v937_v55 = vadd.f32 1e-05, %v889_v11  ;;  %v890_v12 = vsub.f32 %v858_v3, %v874_v37  ;;  %v1265_v49 = vpack.c.bf16 %v1235_v20, %v1233_v6  ;;  %v1173_v7 = vadd.f32 1.0, %v2930_v47 }
 0x256   : > { %v1175_v48 = vadd.f32 1.0, %v2932_v18  ;;  %v970_v4 = vmul.f32 %v4084_v52, %v5169_v19  ;;  %v1011_v39 = vmul.f32 %v3944_v30, %v968_v53  ;;  %v5170_v16 = vsub.f32 %v3799_v36, %v3981_v27 }
 0x257   : > { %2943 = vrsqrt.f32 %v937_v55  ;;  %v938_v28 = vadd.f32 1e-05, %v890_v12  ;;  %1520 = vmatmul.mubr.bf16.vlgmr.msra.gmra.mrb[0].mxu1 %v1265_v49  ;;  %v5171_v8 = vsub.f32 %v3805_v43, %v3993_v1  ;;  %v5172_v12 = vsub.f32 %v3826_v5, %v4013_v57 }
 0x258   : > { %2945 = vrcp.f32 %v1173_v7  ;;  %v967_v6 = vmul.f32 %v4073_v10, %v5170_v16  ;;  %v1013_v53 = vmul.f32 %v3944_v30, %v970_v4  ;;  %v4185_v3 = vadd.f32 %v3952_v44, %v1011_v39 }
 0x259   : > { %v969_v37 = vmul.f32 %v4084_v52, %v5171_v8  ;;  %v972_v50 = vmul.f32 %v4103_v32, %v5172_v12  ;;  %v4181_v11 = vpop.eup %2933  ;;  %2947 = vrsqrt.f32 %v938_v28  ;;  %v5173_v36 = vsub.f32 %v3834_v14, %v4022_v58  ;;  %v5174_v12 = vld [vmem:[#allocation19_spill] sm:$0xff] }
 0x25a   : > { %2949 = vrcp.f32 %v1175_v48  ;;  %v1010_v27 = vmul.f32 %v3939_v22, %v967_v6  ;;  %v4197_v52 = vadd.f32 %v3952_v44, %v1013_v53  ;;  %v1086_v20 = vsub.f32 0.0, %v4185_v3 }
 0x25b   : > { %v974_v43 = vmul.f32 %v4118_v2, %v5173_v36  ;;  %v1012_v5 = vmul.f32 %v3939_v22, %v969_v37  ;;  %v1015_v1 = vmul.f32 %v3944_v30, %v972_v50  ;;  %v4194_v10 = vpop.eup %2935  ;;  %2951 = vpow2.f32 %v1127_v60 }
 0x25c   : > { %2953 = vpow2.f32 %v1121_v56  ;;  %v4202_v14 = vadd.f32 %v3947_v34, %v1010_v27  ;;  %v2938_v18 = vpop.eup %2937  ;;  %v1088_v60 = vsub.f32 0.0, %v4197_v52  ;;  %v1131_v55 = vmul.f32 1.442695, %v1086_v20 }
 0x25d   : > { %v1017_v47 = vmul.f32 %v3944_v30, %v974_v43  ;;  %v4205_v23 = vadd.f32 %v3947_v34, %v1012_v5  ;;  %v4208_v25 = vadd.f32 %v3952_v44, %v1015_v1  ;;  %2955 = vpow2.f32 %v1125_v17  ;;  %v2940_v7 = vpop.eup %2939  ;;  %v5176_v5 = vld [vmem:[#allocation20_spill] sm:$0xff] }
 0x25e   : > { %v1238_v48 = vmul.f32 %v2938_v18, %v4029_v61  ;;  %v1085_v56 = vsub.f32 0.0, %v4202_v14  ;;  %v1240_v4 = vmul.f32 %v2940_v7, %v4032_v15  ;;  %2957 = vpow2.f32 %v1131_v55  ;;  %v2942_v16 = vpop.eup %2941  ;;  %v5180_v7 = vld [vmem:[#allocation21_spill] sm:$0xff] }
 0x25f   : > { %v4212_v49 = vadd.f32 %v3952_v44, %v1017_v47  ;;  %v1087_v28 = vsub.f32 0.0, %v4205_v23  ;;  %v1090_v19 = vsub.f32 0.0, %v4208_v25  ;;  %v1135_v39 = vmul.f32 1.442695, %v1088_v60 }
 0x260   : > { %v1129_v6 = vmul.f32 1.442695, %v1085_v56  ;;  %v5175_v50 = vsub.f32 %v5174_v12, %v4013_v57  ;;  %v1268_v36 = vpack.c.bf16 %v1240_v4, %v1238_v48  ;;  %v1178_v43 = vadd.f32 1.0, %v2942_v16 }
 0x261   : > { %v1092_v17 = vsub.f32 0.0, %v4212_v49  ;;  %v1133_v8 = vmul.f32 1.442695, %v1087_v28  ;;  %v1139_v37 = vmul.f32 1.442695, %v1090_v19  ;;  %v4224_v53 = vpop.eup %2943  ;;  %2959 = vpow2.f32 %v1135_v39  ;;  %v5182_v39 = vld [vmem:[#allocation22_spill] sm:$0xff] }
 0x262   : > { %v971_v61 = vmul.f32 %v4103_v32, %v5175_v50  ;;  %v2946_v15 = vpop.eup %2945  ;;  %2961 = vpow2.f32 %v1129_v6  ;;  %v5177_v1 = vsub.f32 %v5176_v5, %v4022_v58  ;;  %v5178_v57 = vsub.f32 %v3850_v31, %v4058_v0  ;;  %1529 = vmatprep.mubr.bf16.mxu1 %v1268_v36 }
 0x263   : > { %v1143_v27 = vmul.f32 1.442695, %v1092_v17  ;;  %v4235_v18 = vpop.eup %2947  ;;  %v1237_v60 = vmul.f32 %v2946_v15, %v4071_v62  ;;  %2963 = vrcp.f32 %v1178_v43  ;;  %v5179_v55 = vsub.f32 %v3858_v40, %v4066_v45 }
 0x264   : > { %v973_v20 = vmul.f32 %v4118_v2, %v5177_v1  ;;  %v1014_v47 = vmul.f32 %v3939_v22, %v971_v61  ;;  %v976_v32 = vmul.f32 %v4141_v59, %v5178_v57  ;;  %v5181_v2 = vsub.f32 %v5180_v7, %v4058_v0  ;;  %v2950_v56 = vpop.eup %2949 }
 0x265   : > { %v978_v58 = vmul.f32 %v4155_v9, %v5179_v55  ;;  %2965 = vpow2.f32 %v1133_v8  ;;  %v2952_v19 = vpop.eup %2951  ;;  %v1239_v4 = vmul.f32 %v2950_v56, %v4076_v51  ;;  %v5183_v0 = vsub.f32 %v5182_v39, %v4066_v45 }
 0x266   : > { %v975_v48 = vmul.f32 %v4141_v59, %v5181_v2  ;;  %v1016_v31 = vmul.f32 %v3939_v22, %v973_v20  ;;  %v4248_v28 = vadd.f32 %v3947_v34, %v1014_v47  ;;  %v1019_v62 = vmul.f32 %v3944_v30, %v976_v32  ;;  %v2954_v17 = vpop.eup %2953 }
 0x267   : > { %2967 = vpow2.f32 %v1139_v37  ;;  %v1021_v40 = vmul.f32 %v3944_v30, %v978_v58  ;;  %v977_v59 = vmul.f32 %v4155_v9, %v5183_v0  ;;  %v1180_v16 = vadd.f32 1.0, %v2952_v19  ;;  %v2956_v12 = vpop.eup %2955  ;;  %v5186_v0 = vld [vmem:[#allocation25_spill] sm:$0xff] }
 0x268   : > { %2969 = vpow2.f32 %v1143_v27  ;;  %v4258_v6 = vadd.f32 %v3947_v34, %v1016_v31  ;;  %v1089_v8 = vsub.f32 0.0, %v4248_v28  ;;  %v1267_v50 = vpack.c.bf16 %v1239_v4, %v1237_v60  ;;  %v2958_v43 = vpop.eup %2957 }
 0x269   : > { %v1177_v61 = vadd.f32 1.0, %v2954_v17  ;;  %v4262_v51 = vadd.f32 %v3952_v44, %v1019_v62  ;;  %v4265_v37 = vadd.f32 %v3952_v44, %v1021_v40  ;;  %2971 = vrcp.f32 %v1180_v16 }
 0x26a   : > { %v1179_v45 = vadd.f32 1.0, %v2956_v12  ;;  %v1091_v9 = vsub.f32 0.0, %v4258_v6  ;;  %v1137_v36 = vmul.f32 1.442695, %v1089_v8  ;;  %1530 = vmatmul.mubr.bf16.gmra.mrb[4].mxu1 %v1267_v50  ;;  %v1018_v5 = vmul.f32 %v3939_v22, %v975_v48 }
 0x26b   : > { %2973 = vrcp.f32 %v1177_v61  ;;  %v1094_v27 = vsub.f32 0.0, %v4262_v51  ;;  %v1096_v15 = vsub.f32 0.0, %v4265_v37  ;;  %v1182_v1 = vadd.f32 1.0, %v2958_v43  ;;  %v2960_v57 = vpop.eup %2959 }
 0x26c   : > { %2975 = vrcp.f32 %v1179_v45  ;;  %v1141_v20 = vmul.f32 1.442695, %v1091_v9  ;;  %v1020_v47 = vmul.f32 %v3939_v22, %v977_v59  ;;  %v4273_v55 = vadd.f32 %v3947_v34, %v1018_v5  ;;  %v2962_v58 = vpop.eup %2961 }
 0x26d   : > { %2977 = vpow2.f32 %v1137_v36  ;;  %v1147_v32 = vmul.f32 1.442695, %v1094_v27  ;;  %v1151_v60 = vmul.f32 1.442695, %v1096_v15  ;;  %v1184_v7 = vadd.f32 1.0, %v2960_v57  ;;  %v2964_v31 = vpop.eup %2963  ;;  %v5187_v27 = vld [vmem:[#allocation23_spill] sm:$0xff] }
 0x26e   : > { %2979 = vrcp.f32 %v1182_v1  ;;  %v4276_v2 = vadd.f32 %v3947_v34, %v1020_v47  ;;  %v5184_v48 = vsub.f32 %v3874_v63, %v4089_v35  ;;  %v1181_v62 = vadd.f32 1.0, %v2962_v58  ;;  %v5189_v47 = vld [vmem:[#allocation24_spill] sm:$0xff] }
 0x26f   : > { %2981 = vpow2.f32 %v1141_v20  ;;  %v1093_v19 = vsub.f32 0.0, %v4273_v55  ;;  %v5185_v4 = vsub.f32 %v3882_v13, %v4096_v24  ;;  %v2966_v39 = vpop.eup %2965  ;;  %v1242_v59 = vmul.f32 %v2964_v31, %v5186_v0 }
 0x270   : > { %v980_v56 = vmul.f32 %v4181_v11, %v5184_v48  ;;  %2983 = vrcp.f32 %v1184_v7  ;;  %v1095_v17 = vsub.f32 0.0, %v4276_v2  ;;  %v1183_v8 = vadd.f32 1.0, %v2966_v39  ;;  %v5191_v48 = vld [vmem:[#allocation26_spill] sm:$0xff] }
 0x271   : > { %v982_v40 = vmul.f32 %v4194_v10, %v5185_v4  ;;  %v2968_v16 = vpop.eup %2967  ;;  %2985 = vrcp.f32 %v1181_v62  ;;  %v1145_v12 = vmul.f32 1.442695, %v1093_v19  ;;  %v5188_v15 = vsub.f32 %v5187_v27, %v4089_v35 }
 0x272   : > { %v1023_v63 = vmul.f32 %v3944_v30, %v980_v56  ;;  %v2970_v61 = vpop.eup %2969  ;;  %v1186_v45 = vadd.f32 1.0, %v2968_v16  ;;  %2987 = vpow2.f32 %v1147_v32  ;;  %v1149_v13 = vmul.f32 1.442695, %v1095_v17 }
 0x273   : > { %v1025_v50 = vmul.f32 %v3944_v30, %v982_v40  ;;  %2989 = vrcp.f32 %v1183_v8  ;;  %v1188_v36 = vadd.f32 1.0, %v2970_v61  ;;  %v979_v5 = vmul.f32 %v4181_v11, %v5188_v15  ;;  %v2972_v1 = vpop.eup %2971 }
 0x274   : > { %v4292_v9 = vadd.f32 %v3952_v44, %v1023_v63  ;;  %2991 = vrcp.f32 %v1186_v45  ;;  %v5190_v57 = vsub.f32 %v5189_v47, %v4096_v24  ;;  %v984_v58 = vmul.f32 %v4224_v53, %v920_v21 }
 0x275   : > { %v4295_v43 = vadd.f32 %v3952_v44, %v1025_v50  ;;  %v2974_v7 = vpop.eup %2973  ;;  %v1244_v56 = vmul.f32 %v2972_v1, %v5191_v48  ;;  %2993 = vrcp.f32 %v1188_v36  ;;  %v1022_v11 = vmul.f32 %v3939_v22, %v979_v5 }
 0x276   : > { %v1098_v20 = vsub.f32 0.0, %v4292_v9  ;;  %v981_v32 = vmul.f32 %v4194_v10, %v5190_v57  ;;  %v2976_v31 = vpop.eup %2975  ;;  %v1241_v62 = vmul.f32 %v2974_v7, %v4144_v26  ;;  %2995 = vpow2.f32 %v1151_v60 }
 0x277   : > { %v1100_v35 = vsub.f32 0.0, %v4295_v43  ;;  %v2978_v19 = vpop.eup %2977  ;;  %v1270_v4 = vpack.c.bf16 %v1244_v56, %v1242_v59  ;;  %v1243_v33 = vmul.f32 %v2976_v31, %v4147_v38  ;;  %2997 = vpow2.f32 %v1145_v12 }
 0x278   : > { %v1155_v24 = vmul.f32 1.442695, %v1098_v20  ;;  %v1024_v10 = vmul.f32 %v3939_v22, %v981_v32  ;;  %v2980_v40 = vpop.eup %2979  ;;  %v1185_v39 = vadd.f32 1.0, %v2978_v19  ;;  %2999 = vpow2.f32 %v1149_v13 }
 0x279   : > { %v1159_v21 = vmul.f32 1.442695, %v1100_v35  ;;  %v4317_v0 = vadd.f32 %v3947_v34, %v1022_v11  ;;  %v2982_v26 = vpop.eup %2981  ;;  %1539 = vmatprep.mubr.bf16.mxu1 %v1270_v4  ;;  %v1269_v60 = vpack.c.bf16 %v1243_v33, %v1241_v62  ;;  %v1246_v63 = vmul.f32 %v2980_v40, %v4185_v3 }
 0x27a   : > { %v4320_v17 = vadd.f32 %v3947_v34, %v1024_v10  ;;  %3001 = vpow2.f32 %v1155_v24  ;;  %v5192_v38 = vsub.f32 %v3906_v46, %v4136_v54  ;;  %v2984_v16 = vpop.eup %2983  ;;  %v1187_v8 = vadd.f32 1.0, %v2982_v26 }
 0x27b   : > { %3003 = vrcp.f32 %v1185_v39  ;;  %v1097_v12 = vsub.f32 0.0, %v4317_v0  ;;  %v2986_v61 = vpop.eup %2985  ;;  %1540 = vmatmul.mubr.bf16.gmra.mrb[8].mxu1 %v1269_v60  ;;  %v1248_v45 = vmul.f32 %v2984_v16, %v4197_v52  ;;  %v1027_v3 = vmul.f32 %v3944_v30, %v984_v58 }
 0x27c   : > { %v986_v59 = vmul.f32 %v4235_v18, %v5192_v38  ;;  %v1099_v50 = vsub.f32 0.0, %v4320_v17  ;;  %3005 = vpow2.f32 %v1159_v21  ;;  %v2988_v36 = vpop.eup %2987  ;;  %v1245_v46 = vmul.f32 %v2986_v61, %v4202_v14 }
 0x27d   : > { %3007 = vrcp.f32 %v1187_v8  ;;  %v1153_v27 = vmul.f32 1.442695, %v1097_v12  ;;  %v2990_v5 = vpop.eup %2989  ;;  %v1272_v1 = vpack.c.bf16 %v1248_v45, %v1246_v63  ;;  %v1190_v20 = vadd.f32 1.0, %v2988_v36 }
 0x27e   : > { %v1029_v13 = vmul.f32 %v3944_v30, %v986_v59  ;;  %v1157_v15 = vmul.f32 1.442695, %v1099_v50  ;;  %v4334_v47 = vadd.f32 %v3952_v44, %v1027_v3  ;;  %v2992_v52 = vpop.eup %2991  ;;  %v1247_v32 = vmul.f32 %v2990_v5, %v4205_v23 }
 0x27f   : > { %3009 = vpow2.f32 %v1153_v27  ;;  %v5193_v30 = vsub.f32 %v3895_v29, %v4128_v42  ;;  %v5194_v58 = vsub.f32 %v3901_v41, %v4136_v54  ;;  %v2994_v48 = vpop.eup %2993  ;;  %1549 = vmatprep.mubr.bf16.mxu1 %v1272_v1  ;;  %v1250_v56 = vmul.f32 %v2992_v52, %v4208_v25 }
 0x280   : > { %v4337_v57 = vadd.f32 %v3952_v44, %v1029_v13  ;;  %v1102_v44 = vsub.f32 0.0, %v4334_v47  ;;  %v2996_v35 = vpop.eup %2995  ;;  %v1271_v11 = vpack.c.bf16 %v1247_v32, %v1245_v46  ;;  %v1252_v23 = vmul.f32 %v2994_v48, %v4212_v49 }
 0x281   : > { %v983_v14 = vmul.f32 %v4224_v53, %v5193_v30  ;;  %v985_v7 = vmul.f32 %v4235_v18, %v5194_v58  ;;  %3011 = vpow2.f32 %v1157_v15  ;;  %v2998_v42 = vpop.eup %2997  ;;  %v1192_v53 = vadd.f32 1.0, %v2996_v35 }
 0x282   : > { %3013 = vrcp.f32 %v1190_v20  ;;  %v1104_v41 = vsub.f32 0.0, %v4337_v57  ;;  %v3000_v18 = vpop.eup %2999  ;;  %v1274_v31 = vpack.c.bf16 %v1252_v23, %v1250_v56  ;;  %v1189_v62 = vadd.f32 1.0, %v2998_v42 }
 0x283   : > { %v1026_v29 = vmul.f32 %v3939_v22, %v983_v14  ;;  %v1028_v54 = vmul.f32 %v3939_v22, %v985_v7  ;;  %1550 = vmatmul.mubr.bf16.gmra.mrb[12].mxu1 %v1271_v11  ;;  %3015 = vrcp.f32 %v1192_v53  ;;  %v1191_v49 = vadd.f32 1.0, %v3000_v18 }
 0x284   : > { %v3002_v24 = vpop.eup %3001  ;;  %v1163_v10 = vmul.f32 1.442695, %v1102_v44  ;;  %1559 = vmatprep.mubr.bf16.mxu1 %v1274_v31  ;;  %3017 = vrcp.f32 %v1189_v62  ;;  %v1167_v40 = vmul.f32 1.442695, %v1104_v41  ;;  %v5195_v62 = vld [vmem:[#allocation17_spill] sm:$0xff] }
 0x285   : > { %v4355_v25 = vadd.f32 %v3947_v34, %v1026_v29  ;;  %v4358_v19 = vadd.f32 %v3947_v34, %v1028_v54  ;;  %v3004_v4 = vpop.eup %3003  ;;  %v1194_v33 = vadd.f32 1.0, %v3002_v24  ;;  %3019 = vrcp.f32 %v1191_v49  ;;  %v5196_v49 = vld [vmem:[#allocation18_spill] sm:$0xff] }
 0x286   : > { %v3006_v21 = vpop.eup %3005  ;;  %v1249_v38 = vmul.f32 %v3004_v4, %v4248_v28 }
 0x287   : > { %v1101_v22 = vsub.f32 0.0, %v4355_v25  ;;  %v1103_v39 = vsub.f32 0.0, %v4358_v19  ;;  %v3008_v26 = vpop.eup %3007  ;;  %v1196_v60 = vadd.f32 1.0, %v3006_v21  ;;  %3021 = vrcp.f32 %v1194_v33 }
 0x288   : > { %v1251_v34 = vmul.f32 %v3008_v26, %v4258_v6  ;;  %3023 = vpow2.f32 %v1163_v10 }
 0x289   : > { %v1161_v63 = vmul.f32 1.442695, %v1101_v22  ;;  %v3010_v59 = vpop.eup %3009  ;;  %3025 = vrcp.f32 %v1196_v60  ;;  %v1165_v16 = vmul.f32 1.442695, %v1103_v39 }
 0x28a   : > { %v1273_v8 = vpack.c.bf16 %v1251_v34, %v1249_v38  ;;  %v1193_v12 = vadd.f32 1.0, %v3010_v59  ;;  %3027 = vpow2.f32 %v1167_v40 }
 0x28b   : > { %v3012_v50 = vpop.eup %3011  ;;  %3029 = vpow2.f32 %v1161_v63 }
 0x28c   : > { %v3014_v61 = vpop.eup %3013  ;;  %1560 = vmatmul.mubr.bf16.gmra.mrb[16].mxu1 %v1273_v8  ;;  %v1195_v45 = vadd.f32 1.0, %v3012_v50  ;;  %3031 = vrcp.f32 %v1193_v12 }
 0x28d   : > { %3033 = vpow2.f32 %v1165_v16  ;;  %v3016_v3 = vpop.eup %3015  ;;  %v1254_v28 = vmul.f32 %v3014_v61, %v4262_v51 }
 0x28e   : > { %3035 = vrcp.f32 %v1195_v45  ;;  %v3018_v13 = vpop.eup %3017  ;;  %v1256_v6 = vmul.f32 %v3016_v3, %v4265_v37 }
 0x28f   : > { %v3020_v36 = vpop.eup %3019  ;;  %v1253_v15 = vmul.f32 %v3018_v13, %v4273_v55 }
 0x290   : > { %v1276_v27 = vpack.c.bf16 %v1256_v6, %v1254_v28  ;;  %v1255_v5 = vmul.f32 %v3020_v36, %v4276_v2 }
 0x291   : > { %v3022_v46 = vpop.eup %3021 }
 0x292   : > { %v3024_v1 = vpop.eup %3023  ;;  %1569 = vmatprep.mubr.bf16.mxu1 %v1276_v27  ;;  %v1275_v52 = vpack.c.bf16 %v1255_v5, %v1253_v15  ;;  %v1258_v14 = vmul.f32 %v3022_v46, %v4292_v9 }
 0x293   : > { %v3026_v20 = vpop.eup %3025  ;;  %v1198_v32 = vadd.f32 1.0, %v3024_v1 }
 0x294   : > { %v3028_v30 = vpop.eup %3027  ;;  %v1260_v58 = vmul.f32 %v3026_v20, %v4295_v43  ;;  %1570 = vmatmul.mubr.bf16.gmra.mrb[20].mxu1 %v1275_v52 }
 0x295   : > { %v3030_v51 = vpop.eup %3029  ;;  %v1200_v37 = vadd.f32 1.0, %v3028_v30  ;;  %3037 = vrcp.f32 %v1198_v32 }
 0x296   : > { %v3032_v7 = vpop.eup %3031  ;;  %v1278_v48 = vpack.c.bf16 %v1260_v58, %v1258_v14  ;;  %v1197_v56 = vadd.f32 1.0, %v3030_v51 }
 0x297   : > { %v3034_v55 = vpop.eup %3033  ;;  %3039 = vrcp.f32 %v1200_v37  ;;  %v1257_v35 = vmul.f32 %v3032_v7, %v4317_v0 }
 0x298   : > { %v3036_v2 = vpop.eup %3035  ;;  %1579 = vmatprep.mubr.bf16.mxu1 %v1278_v48  ;;  %v1199_v44 = vadd.f32 1.0, %v3034_v55  ;;  %3041 = vrcp.f32 %v1197_v56 }
 0x299   : > { %v1259_v11 = vmul.f32 %v3036_v2, %v4320_v17  ;;  %v1313_v17 = vld [vmem:[%s5107_s6] sm:$0x3] }
 0x29a   : > { %3043 = vrcp.f32 %v1199_v44  ;;  %v4380_v24 = vrot.slane %v1313_v17, %v5195_v62 }
 0x29b   : > { %v1277_v9 = vpack.c.bf16 %v1259_v11, %v1257_v35 }
 0x29d   : > { %1580 = vmatmul.mubr.bf16.gmra.mrb[24].mxu1 %v1277_v9 }
 0x29f   : > { %v3038_v43 = vpop.eup %3037 }
 0x2a0   : > { %v1262_v42 = vmul.f32 %v3038_v43, %v4334_v47  ;;  %v4383_v47 = vrot.slane %v1313_v17, %v5196_v49 }
 0x2a1   : > { %v3040_v23 = vpop.eup %3039 }
 0x2a2   : > { %v3042_v29 = vpop.eup %3041  ;;  %v1264_v53 = vmul.f32 %v3040_v23, %v4337_v57 }
 0x2a3   : > { %v1261_v18 = vmul.f32 %v3042_v29, %v4355_v25 }
 0x2a4   : > { %v3044_v41 = vpop.eup %3043  ;;  %v1280_v54 = vpack.c.bf16 %v1264_v53, %v1262_v42 }
 0x2a5   : > { %v1263_v31 = vmul.f32 %v3044_v41, %v4358_v19 }
 0x2a6   : > { %1589 = vmatprep.mubr.bf16.mxu1 %v1280_v54 }
 0x2a7   : > { %v1279_v0 = vpack.c.bf16 %v1263_v31, %v1261_v18 }
 0x2a9   : > { %1590 = vmatmul.mubr.bf16.gmra.mrb[28].mxu1 %v1279_v0 }
 0x32a   : > { %v1521_v57 = vpop.f32.mrb[0].mxu1 }
 0x32b   : > { %v4386_v10 = vadd.f32 %v1521_v57, %v4380_v24  ;;  %v1523_v25 = vpop.f32.mrb[1].mxu1 }
 0x32c   : > { %v4389_v19 = vadd.f32 %v1523_v25, %v4383_v47  ;;  %v1525_v4 = vpop.f32.mrb[2].mxu1 }
 0x32d   : > { %v4392_v33 = vadd.f32 %v1525_v4, %v4380_v24  ;;  %v1527_v22 = vpop.f32.mrb[3].mxu1  ;;  %v1664_v39 = vmul.f32 %v4386_v10, %v4386_v10  ;;  %v2869_v4 = vld [vmem:[#allocation8 + $0x40] sm:$0xff]  }
 0x32e   : > { %v4395_v21 = vadd.f32 %v1527_v22, %v4383_v47  ;;  %v1600_v40 = vadd.f32 %v4389_v19, %v4386_v10  ;;  %v1665_v26 = vmul.f32 %v4389_v19, %v4389_v19  ;;  %2633 = vmatprep.subr.bf16.mxu0 %v2869_v4  ;;  %2697 = vmatprep.subr.bf16.mxu1 %v2869_v4 }
 0x32f   : > { %v1666_v63 = vmul.f32 %v4392_v33, %v4392_v33 }
 0x330   : > { %1601 = vadd.xlane.f32.xlu0 %v1600_v40  ;;  %v1603_v60 = vadd.f32 %v4395_v21, %v4392_v33  ;;  %v1667_v38 = vmul.f32 %v4395_v21, %v4395_v21  ;;  %v1696_v34 = vadd.f32 %v1665_v26, %v1664_v39  ;;  %v2870_v39 = vld [vmem:[#allocation8] sm:$0xff]  }
 0x331   : > { %2634 = vmatpush3.bf16.msra.mxu0 %v2870_v39  ;;  %2705 = vmatpush3.bf16.msra.mxu1 %v2870_v39 }
 0x332   : > { %1604 = vadd.xlane.f32.xlu1 %v1603_v60  ;;  %v1699_v59 = vadd.f32 %v1667_v38, %v1666_v63 }
 0x334   : > { %1697 = vadd.xlane.f32.xlu0 %v1696_v34 }
 0x336   : > { %1700 = vadd.xlane.f32.xlu1 %v1699_v59 }
 0x33d   : > { %v1531_v16 = vpop.f32.mrb[4].mxu1 }
 0x33e   : > { %v4410_v8 = vadd.f32 %v1531_v16, %v4380_v24  ;;  %v1533_v12 = vpop.f32.mrb[5].mxu1 }
 0x33f   : > { %v4413_v50 = vadd.f32 %v1533_v12, %v4383_v47  ;;  %v1535_v61 = vpop.f32.mrb[6].mxu1 }
 0x340   : > { %v4416_v45 = vadd.f32 %v1535_v61, %v4380_v24  ;;  %v1537_v3 = vpop.f32.mrb[7].mxu1  ;;  %v1668_v6 = vmul.f32 %v4410_v8, %v4410_v8 }
 0x341   : > { %v4419_v13 = vadd.f32 %v1537_v3, %v4383_v47  ;;  %v1606_v28 = vadd.f32 %v4413_v50, %v4410_v8  ;;  %v1669_v36 = vmul.f32 %v4413_v50, %v4413_v50 }
 0x342   : > { %v1670_v27 = vmul.f32 %v4416_v45, %v4416_v45 }
 0x343   : > { %1607 = vadd.xlane.f32.xlu0 %v1606_v28  ;;  %v1609_v46 = vadd.f32 %v4419_v13, %v4416_v45  ;;  %v1671_v15 = vmul.f32 %v4419_v13, %v4419_v13  ;;  %v1702_v5 = vadd.f32 %v1669_v36, %v1668_v6 }
 0x345   : > { %1610 = vadd.xlane.f32.xlu1 %v1609_v46  ;;  %v1705_v1 = vadd.f32 %v1671_v15, %v1670_v27 }
 0x347   : > { %1703 = vadd.xlane.f32.xlu0 %v1702_v5 }
 0x349   : > { %1706 = vadd.xlane.f32.xlu1 %v1705_v1 }
 0x34e   : > { %v1541_v20 = vpop.f32.mrb[8].mxu1 }
 0x34f   : > { %v4434_v52 = vadd.f32 %v1541_v20, %v4380_v24  ;;  %v1543_v32 = vpop.f32.mrb[9].mxu1 }
 0x350   : > { %v4437_v30 = vadd.f32 %v1543_v32, %v4383_v47  ;;  %v1545_v14 = vpop.f32.mrb[10].mxu1 }
 0x351   : > { %v4440_v58 = vadd.f32 %v1545_v14, %v4380_v24  ;;  %v1547_v51 = vpop.f32.mrb[11].mxu1  ;;  %v1672_v48 = vmul.f32 %v4434_v52, %v4434_v52 }
 0x352   : > { %v4443_v37 = vadd.f32 %v1547_v51, %v4383_v47  ;;  %v1612_v7 = vadd.f32 %v4437_v30, %v4434_v52  ;;  %v1673_v56 = vmul.f32 %v4437_v30, %v4437_v30 }
 0x353   : > { %v1674_v2 = vmul.f32 %v4440_v58, %v4440_v58 }
 0x354   : > { %1613 = vadd.xlane.f32.xlu0 %v1612_v7  ;;  %v1615_v55 = vadd.f32 %v4443_v37, %v4440_v58  ;;  %v1675_v44 = vmul.f32 %v4443_v37, %v4443_v37  ;;  %v1708_v11 = vadd.f32 %v1673_v56, %v1672_v48 }
 0x356   : > { %1616 = vadd.xlane.f32.xlu1 %v1615_v55  ;;  %v1551_v35 = vpop.f32.mrb[12].mxu1  ;;  %v1711_v42 = vadd.f32 %v1675_v44, %v1674_v2  ;;  %v2871_v44 = vld [vmem:[#allocation8 + $0x48] sm:$0xff]  }
 0x357   : > { %v4458_v9 = vadd.f32 %v1551_v35, %v4380_v24  ;;  %v1553_v43 = vpop.f32.mrb[13].mxu1  ;;  %2635 = vmatprep.subr.bf16.mxu0 %v2871_v44  ;;  %2698 = vmatprep.subr.bf16.mxu1 %v2871_v44 }
 0x358   : > { %v4461_v23 = vadd.f32 %v1553_v43, %v4383_v47  ;;  %1709 = vadd.xlane.f32.xlu0 %v1708_v11  ;;  %v1555_v29 = vpop.f32.mrb[14].mxu1 }
 0x359   : > { %v4464_v53 = vadd.f32 %v1555_v29, %v4380_v24  ;;  %v1557_v41 = vpop.f32.mrb[15].mxu1  ;;  %v1676_v31 = vmul.f32 %v4458_v9, %v4458_v9  ;;  %v2872_v29 = vld [vmem:[#allocation8 + $0x8] sm:$0xff]  }
 0x35a   : > { %v4467_v54 = vadd.f32 %v1557_v41, %v4383_v47  ;;  %1712 = vadd.xlane.f32.xlu1 %v1711_v42  ;;  %v1618_v18 = vadd.f32 %v4461_v23, %v4458_v9  ;;  %v1677_v0 = vmul.f32 %v4461_v23, %v4461_v23  ;;  %2636 = vmatpush3.bf16.msra.mxu0 %v2872_v29 }
 0x35b   : > { %v1678_v57 = vmul.f32 %v4464_v53, %v4464_v53  ;;  %2706 = vmatpush3.bf16.msra.mxu1 %v2872_v29  ;;  %v2877_v29 = vld [vmem:[#allocation8 + $0x60] sm:$0xff]  }
 0x35c   : > { %1619 = vadd.xlane.f32.xlu0 %v1618_v18  ;;  %v1621_v17 = vadd.f32 %v4467_v54, %v4464_v53  ;;  %v1679_v25 = vmul.f32 %v4467_v54, %v4467_v54  ;;  %v1714_v40 = vadd.f32 %v1677_v0, %v1676_v31 }
 0x35e   : > { %1622 = vadd.xlane.f32.xlu1 %v1621_v17  ;;  %v1717_v34 = vadd.f32 %v1679_v25, %v1678_v57 }
 0x35f   : > { %v1561_v22 = vpop.f32.mrb[16].mxu1 }
 0x360   : > { %v4482_v26 = vadd.f32 %v1561_v22, %v4380_v24  ;;  %v1563_v60 = vpop.f32.mrb[17].mxu1  ;;  %1715 = vadd.xlane.f32.xlu0 %v1714_v40 }
 0x361   : > { %v4485_v63 = vadd.f32 %v1563_v60, %v4383_v47  ;;  %v1565_v38 = vpop.f32.mrb[18].mxu1 }
 0x362   : > { %v4488_v59 = vadd.f32 %v1565_v38, %v4380_v24  ;;  %v1567_v16 = vpop.f32.mrb[19].mxu1  ;;  %1718 = vadd.xlane.f32.xlu1 %v1717_v34  ;;  %v1680_v3 = vmul.f32 %v4482_v26, %v4482_v26  ;;  %v2873_v38 = vld [vmem:[#allocation8 + $0x50] sm:$0xff]  }
 0x363   : > { %v4491_v12 = vadd.f32 %v1567_v16, %v4383_v47  ;;  %v1624_v61 = vadd.f32 %v4485_v63, %v4482_v26  ;;  %v1681_v28 = vmul.f32 %v4485_v63, %v4485_v63  ;;  %2637 = vmatprep.subr.bf16.mxu0 %v2873_v38  ;;  %2699 = vmatprep.subr.bf16.mxu1 %v2873_v38 }
 0x364   : > { %v1682_v36 = vmul.f32 %v4488_v59, %v4488_v59 }
 0x365   : > { %1625 = vadd.xlane.f32.xlu0 %v1624_v61  ;;  %v1627_v6 = vadd.f32 %v4491_v12, %v4488_v59  ;;  %v1683_v46 = vmul.f32 %v4491_v12, %v4491_v12  ;;  %v1720_v27 = vadd.f32 %v1681_v28, %v1680_v3  ;;  %v2874_v3 = vld [vmem:[#allocation8 + $0x10] sm:$0xff]  }
 0x366   : > { %2638 = vmatpush3.bf16.msra.mxu0 %v2874_v3  ;;  %2707 = vmatpush3.bf16.msra.mxu1 %v2874_v3 }
 0x367   : > { %1628 = vadd.xlane.f32.xlu1 %v1627_v6  ;;  %v1571_v15 = vpop.f32.mrb[20].mxu1  ;;  %v1723_v20 = vadd.f32 %v1683_v46, %v1682_v36 }
 0x368   : > { %v4506_v5 = vadd.f32 %v1571_v15, %v4380_v24  ;;  %v1573_v1 = vpop.f32.mrb[21].mxu1  ;;  %v2875_v15 = vld [vmem:[#allocation8 + $0x58] sm:$0xff]  }
 0x369   : > { %1721 = vadd.xlane.f32.xlu0 %v1720_v27  ;;  %v4509_v32 = vadd.f32 %v1573_v1, %v4383_v47  ;;  %v1575_v14 = vpop.f32.mrb[22].mxu1  ;;  %2639 = vmatprep.subr.bf16.mxu0 %v2875_v15 }
 0x36a   : > { %v4512_v51 = vadd.f32 %v1575_v14, %v4380_v24  ;;  %v1577_v7 = vpop.f32.mrb[23].mxu1  ;;  %v1684_v55 = vmul.f32 %v4506_v5, %v4506_v5  ;;  %2700 = vmatprep.subr.bf16.mxu1 %v2875_v15 }
 0x36b   : > { %1724 = vadd.xlane.f32.xlu1 %v1723_v20  ;;  %v4515_v48 = vadd.f32 %v1577_v7, %v4383_v47  ;;  %v1630_v56 = vadd.f32 %v4509_v32, %v4506_v5  ;;  %v1685_v2 = vmul.f32 %v4509_v32, %v4509_v32 }
 0x36c   : > { %v1686_v11 = vmul.f32 %v4512_v51, %v4512_v51 }
 0x36d   : > { %1631 = vadd.xlane.f32.xlu0 %v1630_v56  ;;  %v1633_v35 = vadd.f32 %v4515_v48, %v4512_v51  ;;  %v1687_v43 = vmul.f32 %v4515_v48, %v4515_v48  ;;  %v1726_v41 = vadd.f32 %v1685_v2, %v1684_v55  ;;  %v2876_v56 = vld [vmem:[#allocation8 + $0x18] sm:$0xff]  }
 0x36e   : > { %2640 = vmatpush3.bf16.msra.mxu0 %v2876_v56  ;;  %2708 = vmatpush3.bf16.msra.mxu1 %v2876_v56 }
 0x36f   : > { %1634 = vadd.xlane.f32.xlu1 %v1633_v35  ;;  %v1729_v57 = vadd.f32 %v1687_v43, %v1686_v11  ;;  %2641 = vmatprep.subr.bf16.mxu0 %v2877_v29 }
 0x370   : > { %v1581_v42 = vpop.f32.mrb[24].mxu1  ;;  %2701 = vmatprep.subr.bf16.mxu1 %v2877_v29 }
 0x371   : > { %v4530_v18 = vadd.f32 %v1581_v42, %v4380_v24  ;;  %v1583_v31 = vpop.f32.mrb[25].mxu1  ;;  %1727 = vadd.xlane.f32.xlu0 %v1726_v41  ;;  %v2878_v41 = vld [vmem:[#allocation8 + $0x20] sm:$0xff]  }
 0x372   : > { %v4533_v0 = vadd.f32 %v1583_v31, %v4383_v47  ;;  %v1585_v17 = vpop.f32.mrb[26].mxu1  ;;  %2642 = vmatpush3.bf16.msra.mxu0 %v2878_v41  ;;  %v2879_v31 = vld [vmem:[#allocation8 + $0x68] sm:$0xff]   ;;  %2709 = vmatpush3.bf16.msra.mxu1 %v2878_v41 }
 0x373   : > { %v4536_v25 = vadd.f32 %v1585_v17, %v4380_v24  ;;  %v1587_v4 = vpop.f32.mrb[27].mxu1  ;;  %1730 = vadd.xlane.f32.xlu1 %v1729_v57  ;;  %v1688_v39 = vmul.f32 %v4530_v18, %v4530_v18  ;;  %v2880_v17 = vld [vmem:[#allocation8 + $0x28] sm:$0xff]   ;;  %2643 = vmatprep.subr.bf16.mxu0 %v2879_v31  ;;  %v2881_v57 = vld [vmem:[#allocation8 + $0x70] sm:$0xff]  }
 0x374   : > { %v4539_v22 = vadd.f32 %v1587_v4, %v4383_v47  ;;  %v1636_v40 = vadd.f32 %v4533_v0, %v4530_v18  ;;  %v1689_v60 = vmul.f32 %v4533_v0, %v4533_v0  ;;  %2702 = vmatprep.subr.bf16.mxu1 %v2879_v31  ;;  %v2882_v4 = vld [vmem:[#allocation8 + $0x30] sm:$0xff]  }
 0x375   : > { %v1690_v16 = vmul.f32 %v4536_v25, %v4536_v25 }
 0x376   : > { %1637 = vadd.xlane.f32.xlu0 %v1636_v40  ;;  %v1639_v34 = vadd.f32 %v4539_v22, %v4536_v25  ;;  %v1691_v61 = vmul.f32 %v4539_v22, %v4539_v22  ;;  %v1732_v28 = vadd.f32 %v1689_v60, %v1688_v39  ;;  %2644 = vmatpush3.bf16.msra.mxu0 %v2880_v17  ;;  %v2883_v40 = vld [vmem:[#allocation8 + $0x78] sm:$0xff]  }
 0x377   : > { %2710 = vmatpush3.bf16.msra.mxu1 %v2880_v17  ;;  %2645 = vmatprep.subr.bf16.mxu0 %v2881_v57  ;;  %v2884_v39 = vld [vmem:[#allocation8 + $0x38] sm:$0xff]  }
 0x378   : > { %1640 = vadd.xlane.f32.xlu1 %v1639_v34  ;;  %v1735_v6 = vadd.f32 %v1691_v61, %v1690_v16  ;;  %2703 = vmatprep.subr.bf16.mxu1 %v2881_v57 }
 0x37a   : > { %1733 = vadd.xlane.f32.xlu0 %v1732_v28  ;;  %2646 = vmatpush3.bf16.msra.mxu0 %v2882_v4 }
 0x37b   : > { %2711 = vmatpush3.bf16.msra.mxu1 %v2882_v4  ;;  %2647 = vmatprep.subr.bf16.mxu0 %v2883_v40 }
 0x37c   : > { %v1591_v36 = vpop.f32.mrb[28].mxu1  ;;  %1736 = vadd.xlane.f32.xlu1 %v1735_v6  ;;  %2704 = vmatprep.subr.bf16.mxu1 %v2883_v40 }
 0x37d   : > { %v4554_v46 = vadd.f32 %v1591_v36, %v4380_v24  ;;  %v1593_v27 = vpop.f32.mrb[29].mxu1 }
 0x37e   : > { %v4557_v1 = vadd.f32 %v1593_v27, %v4383_v47  ;;  %v1595_v20 = vpop.f32.mrb[30].mxu1  ;;  %2648 = vmatpush3.bf16.msra.mxu0 %v2884_v39 }
 0x37f   : > { %5197 = vst [vmem:[#allocation19_spill] sm:$0xff] %v4554_v46  ;;  %v4560_v14 = vadd.f32 %v1595_v20, %v4380_v24  ;;  %v1597_v7 = vpop.f32.mrb[31].mxu1  ;;  %v1692_v44 = vmul.f32 %v4554_v46, %v4554_v46  ;;  %2712 = vmatpush3.bf16.msra.mxu1 %v2884_v39 }
 0x380   : > { %v4563_v55 = vadd.f32 %v1597_v7, %v4383_v47  ;;  %v1642_v2 = vadd.f32 %v4557_v1, %v4554_v46  ;;  %v1693_v35 = vmul.f32 %v4557_v1, %v4557_v1 }
 0x381   : > { %v1694_v11 = vmul.f32 %v4560_v14, %v4560_v14 }
 0x382   : > { %1643 = vadd.xlane.f32.xlu0 %v1642_v2  ;;  %v1645_v24 = vadd.f32 %v4563_v55, %v4560_v14  ;;  %v1695_v47 = vmul.f32 %v4563_v55, %v4563_v55  ;;  %v1738_v43 = vadd.f32 %v1693_v35, %v1692_v44  ;;  %v1314_v2 = vld [vmem:[%s5108_s7] sm:$0x3] }
 0x383   : > { %v1315_v35 = vld [vmem:[%s5198_s10] sm:$0x3]  ;;  %s3325_s10 = scalar_lea.vmem %s3324_s24, 4096 }
 0x384   : > { %1646 = vadd.xlane.f32.xlu1 %v1645_v24  ;;  %v1741_v42 = vadd.f32 %v1695_v47, %v1694_v11  ;;  %v4596_v17 = vrot.slane %v1315_v35, %v5195_v62  ;;  %v4599_v57 = vrot.slane %v1315_v35, %v5196_v49  ;;  %p3327_p1 = scmp.lt.s32.totalorder %s3325_s10, %s3319_s13 }
 0x386   : > { %1739 = vadd.xlane.f32.xlu0 %v1738_v43  ;;  %v4588_v43 = vrot.slane %v1314_v2, %v5195_v62  ;;  %p3328_p2 = por %p3327_p1, %p3326_p12 }
 0x388   : > { %1742 = vadd.xlane.f32.xlu1 %v1741_v42  ;;  %v4591_v42 = vrot.slane %v1314_v2, %v5196_v49  ;;  %p3329_p4 = pnand %p3328_p2, %p3322_p7 }
 0x3bd   : > { %v1602_v60 = vpop.xlane.xlu0 %1601 }
 0x3be   : > { %v1648_v38 = vmul.f32 0.00390625, %v1602_v60 }
 0x3bf   : > { %v1605_v34 = vpop.xlane.xlu1 %1604 }
 0x3c0   : > { %v1649_v16 = vmul.f32 0.00390625, %v1605_v34  ;;  %v1760_v3 = vmul.f32 %v1648_v38, %v1648_v38  ;;  %v1792_v11 = vsub.f32 %v4386_v10, %v1648_v38  ;;  %v1793_v47 = vsub.f32 %v4389_v19, %v1648_v38 }
 0x3c1   : > { %v1698_v61 = vpop.xlane.xlu0 %1697 }
 0x3c2   : > { %v1744_v28 = vmul.f32 0.00390625, %v1698_v61  ;;  %v1761_v27 = vmul.f32 %v1649_v16, %v1649_v16  ;;  %v1794_v10 = vsub.f32 %v4392_v33, %v1649_v16  ;;  %v1795_v19 = vsub.f32 %v4395_v21, %v1649_v16 }
 0x3c3   : > { %v1701_v6 = vpop.xlane.xlu1 %1700 }
 0x3c4   : > { %v1776_v36 = vsub.f32 %v1744_v28, %v1760_v3  ;;  %v1745_v15 = vmul.f32 0.00390625, %v1701_v6 }
 0x3c6   : > { %v1824_v20 = vadd.f32 1e-05, %v1776_v36  ;;  %v1777_v7 = vsub.f32 %v1745_v15, %v1761_v27 }
 0x3c8   : > { %3045 = vrsqrt.f32 %v1824_v20  ;;  %v1825_v56 = vadd.f32 1e-05, %v1777_v7 }
 0x3ca   : > { %3047 = vrsqrt.f32 %v1825_v56 }
 0x3d0   : > { %v1608_v44 = vpop.xlane.xlu0 %1607 }
 0x3d1   : > { %v4583_v24 = vmul.f32 0.00390625, %v1608_v44 }
 0x3d2   : > { %v1611_v29 = vpop.xlane.xlu1 %1610  ;;  %v3046_v41 = vpop.eup %3045 }
 0x3d3   : > { %v4593_v31 = vmul.f32 0.00390625, %v1611_v29  ;;  %v1856_v4 = vmul.f32 %v3046_v41, %v1792_v11  ;;  %v1857_v39 = vmul.f32 %v3046_v41, %v1793_v47  ;;  %v1762_v38 = vmul.f32 %v4583_v24, %v4583_v24 }
 0x3d4   : > { %v1704_v40 = vpop.xlane.xlu0 %1703  ;;  %v3048_v60 = vpop.eup %3047 }
 0x3d5   : > { %v1746_v34 = vmul.f32 0.00390625, %v1704_v40  ;;  %v1899_v61 = vmul.f32 %v4588_v43, %v1856_v4  ;;  %v1858_v3 = vmul.f32 %v3048_v60, %v1794_v10  ;;  %v1859_v28 = vmul.f32 %v3048_v60, %v1795_v19 }
 0x3d6   : > { %v1707_v62 = vpop.xlane.xlu1 %1706  ;;  %v1900_v49 = vmul.f32 %v4591_v42, %v1857_v39  ;;  %v1763_v33 = vmul.f32 %v4593_v31, %v4593_v31 }
 0x3d7   : > { %v1778_v6 = vsub.f32 %v1746_v34, %v1762_v38  ;;  %v1747_v21 = vmul.f32 0.00390625, %v1707_v62  ;;  %v1901_v16 = vmul.f32 %v4588_v43, %v1858_v3  ;;  %v1902_v36 = vmul.f32 %v4591_v42, %v1859_v28 }
 0x3d8   : > { %v4612_v27 = vadd.f32 %v4599_v57, %v1900_v49  ;;  %v4615_v15 = vadd.f32 %v4596_v17, %v1899_v61  ;;  %v1796_v34 = vsub.f32 %v4410_v8, %v4583_v24  ;;  %v1797_v61 = vsub.f32 %v4413_v50, %v4583_v24 }
 0x3d9   : > { %v1826_v20 = vadd.f32 1e-05, %v1778_v6  ;;  %v1779_v7 = vsub.f32 %v1747_v21, %v1763_v33  ;;  %v4618_v56 = vadd.f32 %v4599_v57, %v1902_v36  ;;  %v4622_v44 = vadd.f32 %v4596_v17, %v1901_v16 }
 0x3da   : > { %v1975_v2 = vsub.f32 0.0, %v4612_v27  ;;  %v1974_v35 = vsub.f32 0.0, %v4615_v15  ;;  %v1798_v6 = vsub.f32 %v4416_v45, %v4593_v31  ;;  %v1799_v33 = vsub.f32 %v4419_v13, %v4593_v31 }
 0x3db   : > { %3049 = vrsqrt.f32 %v1826_v20  ;;  %v1827_v11 = vadd.f32 1e-05, %v1779_v7  ;;  %v1977_v47 = vsub.f32 0.0, %v4618_v56  ;;  %v1976_v41 = vsub.f32 0.0, %v4622_v44 }
 0x3dc   : > { %v2008_v29 = vmul.f32 1.442695, %v1975_v2  ;;  %v2006_v10 = vmul.f32 1.442695, %v1974_v35 }
 0x3dd   : > { %3051 = vrsqrt.f32 %v1827_v11  ;;  %v2012_v19 = vmul.f32 1.442695, %v1977_v47  ;;  %v2010_v4 = vmul.f32 1.442695, %v1976_v41 }
 0x3de   : > { %3053 = vpow2.f32 %v2008_v29 }
 0x3df   : > { %3055 = vpow2.f32 %v2006_v10 }
 0x3e0   : > { %3057 = vpow2.f32 %v2012_v19 }
 0x3e1   : > { %v1614_v40 = vpop.xlane.xlu0 %1613  ;;  %3059 = vpow2.f32 %v2010_v4 }
 0x3e2   : > { %v4627_v39 = vmul.f32 0.00390625, %v1614_v40 }
 0x3e3   : > { %v1617_v60 = vpop.xlane.xlu1 %1616 }
 0x3e4   : > { %v4629_v38 = vmul.f32 0.00390625, %v1617_v60  ;;  %v1764_v28 = vmul.f32 %v4627_v39, %v4627_v39  ;;  %v1800_v2 = vsub.f32 %v4434_v52, %v4627_v39  ;;  %v1801_v4 = vsub.f32 %v4437_v30, %v4627_v39 }
 0x3e5   : > { %v1710_v3 = vpop.xlane.xlu0 %1709  ;;  %v3050_v62 = vpop.eup %3049 }
 0x3e6   : > { %v1748_v49 = vmul.f32 0.00390625, %v1710_v3  ;;  %v1861_v16 = vmul.f32 %v3050_v62, %v1797_v61  ;;  %v1860_v36 = vmul.f32 %v3050_v62, %v1796_v34  ;;  %v1765_v50 = vmul.f32 %v4629_v38, %v4629_v38 }
 0x3e7   : > { %v1713_v21 = vpop.xlane.xlu1 %1712  ;;  %v3052_v20 = vpop.eup %3051 }
 0x3e8   : > { %v1780_v8 = vsub.f32 %v1748_v49, %v1764_v28  ;;  %v1749_v24 = vmul.f32 0.00390625, %v1713_v21  ;;  %v3054_v7 = vpop.eup %3053  ;;  %v1863_v11 = vmul.f32 %v3052_v20, %v1799_v33  ;;  %v1904_v45 = vmul.f32 %v4591_v42, %v1861_v16 }
 0x3e9   : > { %v1620_v35 = vpop.xlane.xlu0 %1619  ;;  %v1862_v47 = vmul.f32 %v3052_v20, %v1798_v6  ;;  %v3056_v29 = vpop.eup %3055  ;;  %v2071_v10 = vadd.f32 1.0, %v3054_v7  ;;  %v1903_v61 = vmul.f32 %v4588_v43, %v1860_v36 }
 0x3ea   : > { %v1828_v13 = vadd.f32 1e-05, %v1780_v8  ;;  %v1781_v31 = vsub.f32 %v1749_v24, %v1765_v50  ;;  %v4646_v41 = vmul.f32 0.00390625, %v1620_v35  ;;  %v3058_v19 = vpop.eup %3057  ;;  %v2070_v60 = vadd.f32 1.0, %v3056_v29 }
 0x3eb   : > { %v1623_v40 = vpop.xlane.xlu1 %1622  ;;  %v1906_v34 = vmul.f32 %v4591_v42, %v1863_v11  ;;  %v3060_v3 = vpop.eup %3059  ;;  %v4653_v28 = vadd.f32 %v4599_v57, %v1904_v45  ;;  %v1905_v49 = vmul.f32 %v4588_v43, %v1862_v47  ;;  %v2073_v16 = vadd.f32 1.0, %v3058_v19 }
 0x3ec   : > { %3061 = vrsqrt.f32 %v1828_v13  ;;  %v1829_v62 = vadd.f32 1e-05, %v1781_v31  ;;  %v4656_v6 = vmul.f32 0.00390625, %v1623_v40  ;;  %v1766_v33 = vmul.f32 %v4646_v41, %v4646_v41 }
 0x3ed   : > { %v1716_v21 = vpop.xlane.xlu0 %1715  ;;  %3063 = vrcp.f32 %v2071_v10  ;;  %v2072_v8 = vadd.f32 1.0, %v3060_v3  ;;  %v4661_v36 = vadd.f32 %v4599_v57, %v1906_v34  ;;  %v1803_v24 = vsub.f32 %v4443_v37, %v4629_v38 }
 0x3ee   : > { %3065 = vrsqrt.f32 %v1829_v62  ;;  %v1750_v20 = vmul.f32 0.00390625, %v1716_v21  ;;  %v1767_v7 = vmul.f32 %v4656_v6, %v4656_v6  ;;  %v1979_v47 = vsub.f32 0.0, %v4653_v28 }
 0x3ef   : > { %v1719_v35 = vpop.xlane.xlu1 %1718  ;;  %3067 = vrcp.f32 %v2073_v16  ;;  %v1981_v13 = vsub.f32 0.0, %v4661_v36  ;;  %v4672_v31 = vadd.f32 %v4596_v17, %v1903_v61  ;;  %v4675_v10 = vadd.f32 %v4596_v17, %v1905_v49 }
 0x3f0   : > { %v1782_v11 = vsub.f32 %v1750_v20, %v1766_v33  ;;  %v1751_v45 = vmul.f32 0.00390625, %v1719_v35  ;;  %3069 = vrcp.f32 %v2070_v60  ;;  %v2016_v34 = vmul.f32 1.442695, %v1979_v47 }
 0x3f1   : > { %3071 = vrcp.f32 %v2072_v8  ;;  %v2020_v62 = vmul.f32 1.442695, %v1981_v13  ;;  %v1978_v33 = vsub.f32 0.0, %v4672_v31  ;;  %v1980_v21 = vsub.f32 0.0, %v4675_v10 }
 0x3f2   : > { %v1626_v29 = vpop.xlane.xlu0 %1625  ;;  %v1830_v37 = vadd.f32 1e-05, %v1782_v11  ;;  %v1783_v19 = vsub.f32 %v1751_v45, %v1767_v7 }
 0x3f3   : > { %v4677_v40 = vmul.f32 0.00390625, %v1626_v29  ;;  %v2014_v35 = vmul.f32 1.442695, %v1978_v33  ;;  %v2018_v29 = vmul.f32 1.442695, %v1980_v21 }
 0x3f4   : > { %v1629_v3 = vpop.xlane.xlu1 %1628  ;;  %3073 = vrsqrt.f32 %v1830_v37  ;;  %v1831_v16 = vadd.f32 1e-05, %v1783_v19 }
 0x3f5   : > { %v4689_v8 = vmul.f32 0.00390625, %v1629_v3  ;;  %3075 = vpow2.f32 %v2016_v34  ;;  %v1768_v45 = vmul.f32 %v4677_v40, %v4677_v40 }
 0x3f6   : > { %v1722_v7 = vpop.xlane.xlu0 %1721  ;;  %v3062_v11 = vpop.eup %3061  ;;  %3077 = vrsqrt.f32 %v1831_v16 }
 0x3f7   : > { %v1752_v47 = vmul.f32 0.00390625, %v1722_v7  ;;  %v3064_v13 = vpop.eup %3063  ;;  %3079 = vpow2.f32 %v2020_v62  ;;  %v1769_v16 = vmul.f32 %v4689_v8, %v4689_v8  ;;  %v1811_v7 = vsub.f32 %v4491_v12, %v4689_v8 }
 0x3f8   : > { %v1725_v49 = vpop.xlane.xlu1 %1724  ;;  %v3066_v34 = vpop.eup %3065  ;;  %3081 = vpow2.f32 %v2014_v35  ;;  %v1865_v37 = vmul.f32 %v3062_v11, %v1801_v4  ;;  %v1864_v30 = vmul.f32 %v3062_v11, %v1800_v2 }
 0x3f9   : > { %v1784_v33 = vsub.f32 %v1752_v47, %v1768_v45  ;;  %v1753_v60 = vmul.f32 0.00390625, %v1725_v49  ;;  %v3068_v21 = vpop.eup %3067  ;;  %3083 = vpow2.f32 %v2018_v29  ;;  %v1867_v19 = vmul.f32 %v3066_v34, %v1803_v24 }
 0x3fa   : > { %v3070_v3 = vpop.eup %3069  ;;  %v1632_v61 = vpop.xlane.xlu0 %1631  ;;  %v2135_v45 = vmul.f32 %v3064_v13, %v4612_v27  ;;  %v2137_v47 = vmul.f32 %v3068_v21, %v4618_v56  ;;  %v1908_v50 = vmul.f32 %v4591_v42, %v1865_v37  ;;  %v5199_v13 = vsub.f32 %v4440_v58, %v4629_v38 }
 0x3fb   : > { %v1832_v20 = vadd.f32 1e-05, %v1784_v33  ;;  %v1785_v62 = vsub.f32 %v1753_v60, %v1769_v16  ;;  %v3072_v49 = vpop.eup %3071  ;;  %v4708_v35 = vmul.f32 0.00390625, %v1632_v61  ;;  %v1910_v29 = vmul.f32 %v4591_v42, %v1867_v19 }
 0x3fc   : > { %v1635_v24 = vpop.xlane.xlu1 %1634  ;;  %v2167_v33 = vpack.c.bf16 %v2137_v47, %v2135_v45  ;;  %v2134_v60 = vmul.f32 %v3070_v3, %v4615_v15  ;;  %v2136_v27 = vmul.f32 %v3072_v49, %v4622_v44  ;;  %v1866_v37 = vmul.f32 %v3066_v34, %v5199_v13 }
 0x3fd   : > { %v1833_v4 = vadd.f32 1e-05, %v1785_v62  ;;  %3085 = vrsqrt.f32 %v1832_v20  ;;  %v4719_v61 = vmul.f32 0.00390625, %v1635_v24  ;;  %v4729_v44 = vadd.f32 %v4599_v57, %v1908_v50 }
 0x3fe   : > { %v4724_v19 = vpop.eup %3073  ;;  %v1728_v39 = vpop.xlane.xlu0 %1727  ;;  %2349 = vmatprep.mubr.bf16.mxu0 %v2167_v33  ;;  %v2166_v15 = vpack.c.bf16 %v2136_v27, %v2134_v60  ;;  %v4732_v2 = vadd.f32 %v4599_v57, %v1910_v29  ;;  %v1770_v38 = vmul.f32 %v4708_v35, %v4708_v35  ;;  %v1907_v62 = vmul.f32 %v4588_v43, %v1864_v30 }
 0x3ff   : > { %v3076_v20 = vpop.eup %3075  ;;  %3087 = vrsqrt.f32 %v1833_v4  ;;  %v1754_v11 = vmul.f32 0.00390625, %v1728_v39  ;;  %v1771_v34 = vmul.f32 %v4719_v61, %v4719_v61  ;;  %v1983_v21 = vsub.f32 0.0, %v4729_v44 }
 0x400   : > { %v4738_v3 = vpop.eup %3077  ;;  %v1731_v16 = vpop.xlane.xlu1 %1730  ;;  %2350 = vmatmul.mubr.bf16.vlgmr.msra.gmra.mrb[32].mxu0 %v2166_v15  ;;  %v2075_v50 = vadd.f32 1.0, %v3076_v20  ;;  %v1985_v29 = vsub.f32 0.0, %v4732_v2  ;;  %v1909_v4 = vmul.f32 %v4588_v43, %v1866_v37  ;;  %v5200_v13 = vsub.f32 %v4461_v23, %v4646_v41 }
 0x401   : > { %v3080_v45 = vpop.eup %3079  ;;  %v1786_v47 = vsub.f32 %v1754_v11, %v1770_v38  ;;  %v1755_v49 = vmul.f32 0.00390625, %v1731_v16  ;;  %v4755_v58 = vadd.f32 %v4596_v17, %v1907_v62  ;;  %v2024_v23 = vmul.f32 1.442695, %v1983_v21 }
 0x402   : > { %v3082_v24 = vpop.eup %3081  ;;  %v2077_v27 = vadd.f32 1.0, %v3080_v45  ;;  %3089 = vrcp.f32 %v2075_v50  ;;  %v1869_v39 = vmul.f32 %v4724_v19, %v5200_v13  ;;  %v4758_v45 = vadd.f32 %v4596_v17, %v1909_v4 }
 0x403   : > { %v1638_v60 = vpop.xlane.xlu0 %1637  ;;  %v3084_v30 = vpop.eup %3083  ;;  %v1834_v15 = vadd.f32 1e-05, %v1786_v47  ;;  %v1787_v20 = vsub.f32 %v1755_v49, %v1771_v34  ;;  %v2074_v11 = vadd.f32 1.0, %v3082_v24  ;;  %v2028_v56 = vmul.f32 1.442695, %v1985_v29 }
 0x404   : > { %v4752_v38 = vmul.f32 0.00390625, %v1638_v60  ;;  %3091 = vrcp.f32 %v2077_v27  ;;  %v2076_v37 = vadd.f32 1.0, %v3084_v30  ;;  %v1982_v49 = vsub.f32 0.0, %v4755_v58 }
 0x405   : > { %v1641_v16 = vpop.xlane.xlu1 %1640  ;;  %3093 = vrsqrt.f32 %v1834_v15  ;;  %v1835_v50 = vadd.f32 1e-05, %v1787_v20  ;;  %v1984_v4 = vsub.f32 0.0, %v4758_v45  ;;  %v5201_v60 = vsub.f32 %v4467_v54, %v4656_v6 }
 0x406   : > { %v4760_v13 = vmul.f32 0.00390625, %v1641_v16  ;;  %v1772_v34 = vmul.f32 %v4752_v38, %v4752_v38  ;;  %3095 = vrcp.f32 %v2074_v11  ;;  %v5202_v27 = vsub.f32 %v4458_v9, %v4646_v41 }
 0x407   : > { %v1734_v47 = vpop.xlane.xlu0 %1733  ;;  %v4765_v24 = vpop.eup %3085  ;;  %3097 = vrsqrt.f32 %v1835_v50  ;;  %v1871_v21 = vmul.f32 %v4738_v3, %v5201_v60  ;;  %v2022_v50 = vmul.f32 1.442695, %v1982_v49  ;;  %v2026_v54 = vmul.f32 1.442695, %v1984_v4 }
 0x408   : > { %v1756_v62 = vmul.f32 0.00390625, %v1734_v47  ;;  %v1773_v30 = vmul.f32 %v4760_v13, %v4760_v13  ;;  %3099 = vrcp.f32 %v2076_v37  ;;  %v1912_v47 = vmul.f32 %v4591_v42, %v1869_v39 }
 0x409   : > { %v1737_v15 = vpop.xlane.xlu1 %1736  ;;  %v4778_v20 = vpop.eup %3087  ;;  %3101 = vpow2.f32 %v2024_v23  ;;  %v1914_v60 = vmul.f32 %v4591_v42, %v1871_v21  ;;  %v1868_v37 = vmul.f32 %v4724_v19, %v5202_v27  ;;  %v5203_v39 = vsub.f32 %v4464_v53, %v4656_v6 }
 0x40a   : > { %v1788_v11 = vsub.f32 %v1756_v62, %v1772_v34  ;;  %v1757_v16 = vmul.f32 0.00390625, %v1737_v15  ;;  %3103 = vpow2.f32 %v2028_v56  ;;  %v4787_v34 = vadd.f32 %v4599_v57, %v1912_v47 }
 0x40b   : > { %3105 = vpow2.f32 %v2022_v50  ;;  %v4790_v56 = vadd.f32 %v4599_v57, %v1914_v60  ;;  %v1870_v23 = vmul.f32 %v4738_v3, %v5203_v39  ;;  %v1911_v41 = vmul.f32 %v4588_v43, %v1868_v37 }
 0x40c   : > { %v1836_v33 = vadd.f32 1e-05, %v1788_v11  ;;  %v1789_v52 = vsub.f32 %v1757_v16, %v1773_v30  ;;  %v3090_v29 = vpop.eup %3089  ;;  %3107 = vpow2.f32 %v2026_v54  ;;  %v1987_v21 = vsub.f32 0.0, %v4787_v34 }
 0x40d   : > { %v1989_v27 = vsub.f32 0.0, %v4790_v56  ;;  %v1913_v53 = vmul.f32 %v4588_v43, %v1870_v23  ;;  %v2139_v11 = vmul.f32 %v3090_v29, %v4653_v28  ;;  %v1875_v28 = vmul.f32 %v4778_v20, %v1811_v7 }
 0x40e   : > { %3109 = vrsqrt.f32 %v1836_v33  ;;  %v1837_v9 = vadd.f32 1e-05, %v1789_v52  ;;  %v3092_v19 = vpop.eup %3091  ;;  %v4810_v33 = vadd.f32 %v4596_v17, %v1911_v41  ;;  %v2032_v16 = vmul.f32 1.442695, %v1987_v21 }
 0x40f   : > { %v1644_v4 = vpop.xlane.xlu0 %1643  ;;  %v4804_v6 = vpop.eup %3093  ;;  %v2141_v52 = vmul.f32 %v3092_v19, %v4661_v36  ;;  %v2036_v50 = vmul.f32 1.442695, %v1989_v27  ;;  %v4814_v54 = vadd.f32 %v4596_v17, %v1913_v53  ;;  %v5205_v36 = vsub.f32 %v4485_v63, %v4677_v40 }
 0x410   : > { %3111 = vrsqrt.f32 %v1837_v9  ;;  %v4806_v3 = vmul.f32 0.00390625, %v1644_v4  ;;  %5204 = vst [vmem:[#allocation20_spill] sm:$0xff] %v4810_v33  ;;  %v3096_v30 = vpop.eup %3095  ;;  %v1986_v19 = vsub.f32 0.0, %v4810_v33 }
 0x411   : > { %v1647_v15 = vpop.xlane.xlu1 %1646  ;;  %v4816_v47 = vpop.eup %3097  ;;  %v1873_v39 = vmul.f32 %v4765_v24, %v5205_v36  ;;  %v2169_v41 = vpack.c.bf16 %v2141_v52, %v2139_v11  ;;  %3113 = vpow2.f32 %v2032_v16  ;;  %v2138_v12 = vmul.f32 %v3096_v30, %v4672_v31 }
 0x412   : > { %v4820_v37 = vmul.f32 0.00390625, %v1647_v15  ;;  %v3100_v29 = vpop.eup %3099  ;;  %v1774_v63 = vmul.f32 %v4806_v3, %v4806_v3  ;;  %3115 = vpow2.f32 %v2036_v50  ;;  %v1988_v52 = vsub.f32 0.0, %v4814_v54 }
 0x413   : > { %v1740_v9 = vpop.xlane.xlu0 %1739  ;;  %v3102_v4 = vpop.eup %3101  ;;  %2357 = vmatprep.mubr.bf16.mxu0 %v2169_v41  ;;  %v2140_v15 = vmul.f32 %v3100_v29, %v4675_v10  ;;  %v2030_v62 = vmul.f32 1.442695, %v1986_v19  ;;  %v5206_v50 = vsub.f32 %v4530_v18, %v4752_v38  ;;  %v1916_v19 = vmul.f32 %v4591_v42, %v1873_v39 }
 0x414   : > { %v1758_v21 = vmul.f32 0.00390625, %v1740_v9  ;;  %v1775_v27 = vmul.f32 %v4820_v37, %v4820_v37  ;;  %v3104_v7 = vpop.eup %3103  ;;  %v2079_v36 = vadd.f32 1.0, %v3102_v4  ;;  %v2034_v46 = vmul.f32 1.442695, %v1988_v52 }
 0x415   : > { %v1743_v53 = vpop.xlane.xlu1 %1742  ;;  %v3106_v11 = vpop.eup %3105  ;;  %v2081_v23 = vadd.f32 1.0, %v3104_v7  ;;  %v2168_v49 = vpack.c.bf16 %v2140_v15, %v2138_v12  ;;  %v1918_v4 = vmul.f32 %v4591_v42, %v1875_v28  ;;  %v5208_v18 = vsub.f32 %v4488_v59, %v4689_v8 }
 0x416   : > { %v1790_v16 = vsub.f32 %v1758_v21, %v1774_v63  ;;  %v1759_v60 = vmul.f32 0.00390625, %v1743_v53  ;;  %v3108_v9 = vpop.eup %3107  ;;  %3117 = vrcp.f32 %v2079_v36  ;;  %v2078_v33 = vadd.f32 1.0, %v3106_v11 }
 0x417   : > { %3119 = vrcp.f32 %v2081_v23  ;;  %v2080_v10 = vadd.f32 1.0, %v3108_v9  ;;  %2358 = vmatmul.mubr.bf16.gmra.mrb[36].mxu0 %v2168_v49  ;;  %v4864_v28 = vadd.f32 %v4599_v57, %v1916_v19 }
 0x418   : > { %v4840_v31 = vpop.eup %3109  ;;  %v1838_v30 = vadd.f32 1e-05, %v1790_v16  ;;  %v1791_v41 = vsub.f32 %v1759_v60, %v1775_v27  ;;  %3121 = vrcp.f32 %v2078_v33  ;;  %v5207_v60 = vsub.f32 %v4482_v26, %v4677_v40 }
 0x419   : > { %v1880_v29 = vmul.f32 %v4840_v31, %v5206_v50  ;;  %v1874_v27 = vmul.f32 %v4778_v20, %v5208_v18  ;;  %v5209_v33 = vsub.f32 %v4536_v25, %v4760_v13  ;;  %v4867_v26 = vadd.f32 %v4599_v57, %v1918_v4 }
 0x41a   : > { %v4848_v63 = vpop.eup %3111  ;;  %3123 = vrsqrt.f32 %v1838_v30  ;;  %v1839_v21 = vadd.f32 1e-05, %v1791_v41  ;;  %v1872_v23 = vmul.f32 %v4765_v24, %v5207_v60  ;;  %v1991_v25 = vsub.f32 0.0, %v4864_v28 }
 0x41b   : > { %v1923_v49 = vmul.f32 %v4588_v43, %v1880_v29  ;;  %v1882_v39 = vmul.f32 %v4848_v63, %v5209_v33  ;;  %3125 = vrcp.f32 %v2080_v10  ;;  %v1917_v59 = vmul.f32 %v4588_v43, %v1874_v27  ;;  %v3114_v8 = vpop.eup %3113 }
 0x41c   : > { %3127 = vrsqrt.f32 %v1839_v21  ;;  %v1915_v40 = vmul.f32 %v4588_v43, %v1872_v23  ;;  %v5210_v20 = vsub.f32 %v4509_v32, %v4708_v35  ;;  %v2083_v7 = vadd.f32 1.0, %v3114_v8  ;;  %v3116_v36 = vpop.eup %3115 }
 0x41d   : > { %v4872_v24 = vmul.f32 %v4588_v43, %v1882_v39  ;;  %3129 = vpow2.f32 %v2030_v62  ;;  %v1993_v53 = vsub.f32 0.0, %v4867_v26  ;;  %v2040_v52 = vmul.f32 1.442695, %v1991_v25 }
 0x41e   : > { %v1877_v12 = vmul.f32 %v4804_v6, %v5210_v20  ;;  %3131 = vpow2.f32 %v2034_v46  ;;  %v4881_v15 = vadd.f32 %v4596_v17, %v1915_v40  ;;  %v4884_v11 = vadd.f32 %v4596_v17, %v1917_v59 }
 0x41f   : > { %v5211_v62 = vsub.f32 %v4515_v48, %v4719_v61  ;;  %v2085_v9 = vadd.f32 1.0, %v3116_v36  ;;  %3133 = vrcp.f32 %v2083_v7  ;;  %v2044_v46 = vmul.f32 1.442695, %v1993_v53 }
 0x420   : > { %v1920_v32 = vmul.f32 %v4591_v42, %v1877_v12  ;;  %v1990_v30 = vsub.f32 0.0, %v4881_v15  ;;  %v3118_v41 = vpop.eup %3117  ;;  %3135 = vpow2.f32 %v2040_v52  ;;  %v1992_v10 = vsub.f32 0.0, %v4884_v11 }
 0x421   : > { %v1879_v16 = vmul.f32 %v4816_v47, %v5211_v62  ;;  %v3120_v19 = vpop.eup %3119  ;;  %v2143_v48 = vmul.f32 %v3118_v41, %v4729_v44  ;;  %3137 = vrcp.f32 %v2085_v9  ;;  %v5212_v21 = vsub.f32 %v4506_v5, %v4708_v35 }
 0x422   : > { %v4895_v29 = vadd.f32 %v4599_v57, %v1920_v32  ;;  %v2038_v4 = vmul.f32 1.442695, %v1990_v30  ;;  %v3122_v23 = vpop.eup %3121  ;;  %v2145_v18 = vmul.f32 %v3120_v19, %v4732_v2  ;;  %3139 = vpow2.f32 %v2044_v46 }
 0x423   : > { %v1922_v50 = vmul.f32 %v4591_v42, %v1879_v16  ;;  %v1876_v60 = vmul.f32 %v4804_v6, %v5212_v21  ;;  %v2042_v27 = vmul.f32 1.442695, %v1992_v10  ;;  %v2142_v40 = vmul.f32 %v3122_v23, %v4755_v58 }
 0x424   : > { %v4906_v39 = vpop.eup %3123  ;;  %3141 = vpow2.f32 %v2038_v4  ;;  %v1995_v44 = vsub.f32 0.0, %v4895_v29  ;;  %v5213_v5 = vsub.f32 %v4512_v51, %v4719_v61  ;;  %v2171_v59 = vpack.c.bf16 %v2145_v18, %v2143_v48 }
 0x425   : > { %v4904_v33 = vadd.f32 %v4599_v57, %v1922_v50  ;;  %v3126_v6 = vpop.eup %3125  ;;  %3143 = vpow2.f32 %v2042_v27  ;;  %v1919_v8 = vmul.f32 %v4588_v43, %v1876_v60  ;;  %v5214_v7 = vsub.f32 %v4533_v0, %v4752_v38 }
 0x426   : > { %v1878_v35 = vmul.f32 %v4816_v47, %v5213_v5  ;;  %v4916_v25 = vpop.eup %3127  ;;  %v2144_v20 = vmul.f32 %v3126_v6, %v4758_v45  ;;  %v2048_v58 = vmul.f32 1.442695, %v1995_v44  ;;  %2365 = vmatprep.mubr.bf16.mxu0 %v2171_v59  ;;  %v5215_v36 = vsub.f32 %v4539_v22, %v4760_v13 }
 0x427   : > { %v1997_v2 = vsub.f32 0.0, %v4904_v33  ;;  %v1881_v51 = vmul.f32 %v4840_v31, %v5214_v7  ;;  %v3130_v61 = vpop.eup %3129  ;;  %v4925_v53 = vadd.f32 %v4596_v17, %v1919_v8  ;;  %v4932_v45 = vadd.f32 %v4596_v17, %v1923_v49 }
 0x428   : > { %v1921_v12 = vmul.f32 %v4588_v43, %v1878_v35  ;;  %v1883_v52 = vmul.f32 %v4848_v63, %v5215_v36  ;;  %v3132_v62 = vpop.eup %3131  ;;  %v2170_v16 = vpack.c.bf16 %v2144_v20, %v2142_v40  ;;  %v2082_v32 = vadd.f32 1.0, %v3130_v61 }
 0x429   : > { %v2052_v47 = vmul.f32 1.442695, %v1997_v2  ;;  %3145 = vpow2.f32 %v2048_v58  ;;  %v2084_v38 = vadd.f32 1.0, %v3132_v62  ;;  %v1994_v31 = vsub.f32 0.0, %v4925_v53  ;;  %v3134_v46 = vpop.eup %3133 }
 0x42a   : > { %v4935_v0 = vadd.f32 %v4596_v17, %v1921_v12  ;;  %v1924_v9 = vmul.f32 %v4591_v42, %v1881_v51  ;;  %2366 = vmatmul.mubr.bf16.gmra.mrb[40].mxu0 %v2170_v16  ;;  %v1926_v13 = vmul.f32 %v4591_v42, %v1883_v52  ;;  %v4943_v63 = vadd.f32 %v4596_v17, %v4872_v24  ;;  %v3136_v49 = vpop.eup %3135  ;;  %v5217_v12 = vld [vmem:[#allocation19_spill] sm:$0xff] }
 0x42b   : > { %3147 = vpow2.f32 %v2052_v47  ;;  %v1823_v30 = vsub.f32 %v4563_v55, %v4820_v37  ;;  %v2046_v41 = vmul.f32 1.442695, %v1994_v31  ;;  %v3138_v50 = vpop.eup %3137  ;;  %v2147_v19 = vmul.f32 %v3134_v46, %v4787_v34  ;;  %v5219_v31 = vld [vmem:[#allocation20_spill] sm:$0xff] }
 0x42c   : > { %3149 = vrcp.f32 %v2082_v32  ;;  %v1996_v22 = vsub.f32 0.0, %v4935_v0  ;;  %v4948_v10 = vadd.f32 %v4599_v57, %v1924_v9  ;;  %v2087_v48 = vadd.f32 1.0, %v3136_v49  ;;  %v3140_v60 = vpop.eup %3139 }
 0x42d   : > { %3151 = vrcp.f32 %v2084_v38  ;;  %v4952_v21 = vadd.f32 %v4599_v57, %v1926_v13  ;;  %v2149_v24 = vmul.f32 %v3138_v50, %v4790_v56  ;;  %v1998_v55 = vsub.f32 0.0, %v4932_v45 }
 0x42e   : > { %v2050_v4 = vmul.f32 1.442695, %v1996_v22  ;;  %3153 = vpow2.f32 %v2046_v41  ;;  %v1999_v23 = vsub.f32 0.0, %v4948_v10  ;;  %v3142_v18 = vpop.eup %3141  ;;  %v2089_v27 = vadd.f32 1.0, %v3140_v60 }
 0x42f   : > { %3155 = vrcp.f32 %v2087_v48  ;;  %v2001_v40 = vsub.f32 0.0, %v4952_v21  ;;  %v2000_v34 = vsub.f32 0.0, %v4943_v63  ;;  %v3144_v44 = vpop.eup %3143  ;;  %v2173_v5 = vpack.c.bf16 %v2149_v24, %v2147_v19 }
 0x430   : > { %v2086_v35 = vadd.f32 1.0, %v3142_v18  ;;  %3157 = vpow2.f32 %v2050_v4  ;;  %v2056_v6 = vmul.f32 1.442695, %v1999_v23  ;;  %v1822_v56 = vsub.f32 %v4560_v14, %v4820_v37 }
 0x431   : > { %3159 = vrcp.f32 %v2089_v27  ;;  %v2088_v59 = vadd.f32 1.0, %v3144_v44  ;;  %v2060_v2 = vmul.f32 1.442695, %v2001_v40  ;;  %2373 = vmatprep.mubr.bf16.mxu0 %v2173_v5  ;;  %v5216_v8 = vsub.f32 %v4557_v1, %v4806_v3 }
 0x432   : > { %3161 = vrcp.f32 %v2086_v35  ;;  %v1887_v58 = vmul.f32 %v4916_v25, %v1823_v30  ;;  %v5218_v7 = vsub.f32 %v5217_v12, %v4806_v3  ;;  %v2054_v14 = vmul.f32 1.442695, %v1998_v55 }
 0x433   : > { %v1885_v20 = vmul.f32 %v4906_v39, %v5216_v8  ;;  %v3146_v61 = vpop.eup %3145  ;;  %3163 = vrcp.f32 %v2088_v59  ;;  %v2058_v37 = vmul.f32 1.442695, %v2000_v34  ;;  %v1886_v47 = vmul.f32 %v4916_v25, %v1822_v56 }
 0x434   : > { %v1884_v51 = vmul.f32 %v4906_v39, %v5218_v7  ;;  %v2091_v52 = vadd.f32 1.0, %v3146_v61  ;;  %3165 = vpow2.f32 %v2056_v6  ;;  %v1930_v62 = vmul.f32 %v4591_v42, %v1887_v58 }
 0x435   : > { %v3148_v36 = vpop.eup %3147  ;;  %v1928_v1 = vmul.f32 %v4591_v42, %v1885_v20  ;;  %3167 = vpow2.f32 %v2060_v2  ;;  %v1929_v39 = vmul.f32 %v4588_v43, %v1886_v47 }
 0x436   : > { %v3150_v16 = vpop.eup %3149  ;;  %v2093_v32 = vadd.f32 1.0, %v3148_v36  ;;  %v1927_v3 = vmul.f32 %v4588_v43, %v1884_v51  ;;  %3169 = vrcp.f32 %v2091_v52  ;;  %v4980_v46 = vadd.f32 %v4599_v57, %v1930_v62 }
 0x437   : > { %v3152_v38 = vpop.eup %3151  ;;  %v2146_v9 = vmul.f32 %v3150_v16, %v5219_v31  ;;  %v4977_v25 = vadd.f32 %v4599_v57, %v1928_v1  ;;  %v4987_v13 = vadd.f32 %v4596_v17, %v1929_v39 }
 0x438   : > { %v2148_v22 = vmul.f32 %v3152_v38, %v4814_v54  ;;  %3171 = vrcp.f32 %v2093_v32  ;;  %v4984_v42 = vadd.f32 %v4596_v17, %v1927_v3  ;;  %v3154_v43 = vpop.eup %3153  ;;  %v2005_v30 = vsub.f32 0.0, %v4980_v46 }
 0x439   : > { %3173 = vpow2.f32 %v2054_v14  ;;  %v2003_v49 = vsub.f32 0.0, %v4977_v25  ;;  %v3156_v41 = vpop.eup %3155  ;;  %v2090_v19 = vadd.f32 1.0, %v3154_v43  ;;  %v2004_v60 = vsub.f32 0.0, %v4987_v13 }
 0x43a   : > { %v2172_v50 = vpack.c.bf16 %v2148_v22, %v2146_v9  ;;  %3175 = vpow2.f32 %v2058_v37  ;;  %v2002_v57 = vsub.f32 0.0, %v4984_v42  ;;  %v3158_v54 = vpop.eup %3157  ;;  %v2068_v4 = vmul.f32 1.442695, %v2005_v30 }
 0x43b   : > { %v2064_v48 = vmul.f32 1.442695, %v2003_v49  ;;  %v3160_v24 = vpop.eup %3159  ;;  %v2092_v17 = vadd.f32 1.0, %v3158_v54  ;;  %3177 = vrcp.f32 %v2090_v19  ;;  %v2151_v18 = vmul.f32 %v3156_v41, %v4864_v28 }
 0x43c   : > { %2374 = vmatmul.mubr.bf16.gmra.mrb[44].mxu0 %v2172_v50  ;;  %v2062_v23 = vmul.f32 1.442695, %v2002_v57  ;;  %v3162_v55 = vpop.eup %3161  ;;  %v2153_v27 = vmul.f32 %v3160_v24, %v4867_v26  ;;  %v2066_v40 = vmul.f32 1.442695, %v2004_v60  ;;  %v5012_v60 = vld [vmem:[%s5220_s15] ss:$0 sm:$0xff] }
 0x43d   : > { %3179 = vpow2.f32 %v2064_v48  ;;  %v3164_v34 = vpop.eup %3163  ;;  %v2150_v35 = vmul.f32 %v3162_v55, %v4881_v15 }
 0x43e   : > { %3181 = vrcp.f32 %v2092_v17  ;;  %v3166_v44 = vpop.eup %3165  ;;  %v2175_v5 = vpack.c.bf16 %v2153_v27, %v2151_v18  ;;  %v2152_v6 = vmul.f32 %v3164_v34, %v4884_v11 }
 0x43f   : > { %3183 = vpow2.f32 %v2068_v4  ;;  %v3168_v56 = vpop.eup %3167  ;;  %v2095_v59 = vadd.f32 1.0, %v3166_v44 }
 0x440   : > { %3185 = vpow2.f32 %v2062_v23  ;;  %v3170_v2 = vpop.eup %3169  ;;  %2381 = vmatprep.mubr.bf16.mxu0 %v2175_v5  ;;  %v2174_v8 = vpack.c.bf16 %v2152_v6, %v2150_v35  ;;  %v2097_v28 = vadd.f32 1.0, %v3168_v56 }
 0x441   : > { %3187 = vpow2.f32 %v2066_v40  ;;  %v2155_v58 = vmul.f32 %v3170_v2, %v4895_v29 }
 0x442   : > { %v3172_v26 = vpop.eup %3171  ;;  %3189 = vrcp.f32 %v2095_v59 }
 0x443   : > { %v3174_v20 = vpop.eup %3173  ;;  %v2157_v12 = vmul.f32 %v3172_v26, %v4904_v33  ;;  %3191 = vrcp.f32 %v2097_v28 }
 0x444   : > { %v3176_v15 = vpop.eup %3175  ;;  %2382 = vmatmul.mubr.bf16.gmra.mrb[48].mxu0 %v2174_v8  ;;  %v2094_v11 = vadd.f32 1.0, %v3174_v20 }
 0x445   : > { %v2177_v7 = vpack.c.bf16 %v2157_v12, %v2155_v58  ;;  %v2096_v51 = vadd.f32 1.0, %v3176_v15  ;;  %v3178_v61 = vpop.eup %3177 }
 0x446   : > { %3193 = vrcp.f32 %v2094_v11  ;;  %v2154_v52 = vmul.f32 %v3178_v61, %v4925_v53 }
 0x447   : > { %v3180_v14 = vpop.eup %3179  ;;  %2389 = vmatprep.mubr.bf16.mxu0 %v2177_v7  ;;  %3195 = vrcp.f32 %v2096_v51 }
 0x448   : > { %v3182_v37 = vpop.eup %3181  ;;  %v2099_v47 = vadd.f32 1.0, %v3180_v14 }
 0x449   : > { %v3184_v36 = vpop.eup %3183  ;;  %v2156_v29 = vmul.f32 %v3182_v37, %v4935_v0 }
 0x44a   : > { %v3186_v1 = vpop.eup %3185  ;;  %v2101_v33 = vadd.f32 1.0, %v3184_v36  ;;  %3197 = vrcp.f32 %v2099_v47 }
 0x44b   : > { %v3188_v62 = vpop.eup %3187  ;;  %v2176_v16 = vpack.c.bf16 %v2156_v29, %v2154_v52  ;;  %v2098_v32 = vadd.f32 1.0, %v3186_v1 }
 0x44c   : > { %v3190_v3 = vpop.eup %3189  ;;  %3199 = vrcp.f32 %v2101_v33  ;;  %v2100_v39 = vadd.f32 1.0, %v3188_v62 }
 0x44d   : > { %v3192_v38 = vpop.eup %3191  ;;  %2390 = vmatmul.mubr.bf16.gmra.mrb[52].mxu0 %v2176_v16  ;;  %3201 = vrcp.f32 %v2098_v32  ;;  %v2159_v31 = vmul.f32 %v3190_v3, %v4948_v10 }
 0x44e   : > { %v2161_v9 = vmul.f32 %v3192_v38, %v4952_v21  ;;  %3203 = vrcp.f32 %v2100_v39 }
 0x450   : > { %v3194_v53 = vpop.eup %3193  ;;  %v2179_v22 = vpack.c.bf16 %v2161_v9, %v2159_v31 }
 0x451   : > { %v3196_v0 = vpop.eup %3195  ;;  %v2158_v43 = vmul.f32 %v3194_v53, %v4932_v45 }
 0x452   : > { %2397 = vmatprep.mubr.bf16.mxu1 %v2179_v22  ;;  %v2160_v49 = vmul.f32 %v3196_v0, %v4943_v63 }
 0x454   : > { %v3198_v30 = vpop.eup %3197  ;;  %v2178_v41 = vpack.c.bf16 %v2160_v49, %v2158_v43 }
 0x455   : > { %v2163_v57 = vmul.f32 %v3198_v30, %v4977_v25 }
 0x456   : > { %v3200_v50 = vpop.eup %3199  ;;  %2398 = vmatmul.mubr.bf16.vlgmr.msra.gmra.mrb[32].mxu1 %v2178_v41 }
 0x457   : > { %v3202_v19 = vpop.eup %3201  ;;  %v2165_v10 = vmul.f32 %v3200_v50, %v4980_v46 }
 0x458   : > { %v3204_v21 = vpop.eup %3203  ;;  %v2162_v48 = vmul.f32 %v3202_v19, %v4984_v42 }
 0x459   : > { %v2181_v54 = vpack.c.bf16 %v2165_v10, %v2163_v57  ;;  %v2164_v4 = vmul.f32 %v3204_v21, %v4987_v13 }
 0x45b   : > { %2405 = vmatprep.mubr.bf16.mxu1 %v2181_v54  ;;  %v2180_v45 = vpack.c.bf16 %v2164_v4, %v2162_v48 }
 0x45e   : > { %2406 = vmatmul.mubr.bf16.gmra.mrb[36].mxu1 %v2180_v45 }
 0x4d3   : > { %v2649_v63 = vpop.f32.mrb[32].mxu0 }
 0x4d4   : > { %v2650_v24 = vpop.f32.mrb[33].mxu0 }
 0x4d5   : > { %v2651_v25 = vadd.f32 %v2650_v24, %v2649_v63  ;;  %v2652_v17 = vpop.f32.mrb[34].mxu0 }
 0x4d6   : > { %v2653_v46 = vpop.f32.mrb[35].mxu0 }
 0x4d7   : > { %v2352_v23 = vadd.f32 %v2651_v25, %v5012_v60  ;;  %v2654_v55 = vadd.f32 %v2653_v46, %v2652_v17 }
 0x4d9   : > { %2414 = vst [vmem:[%s5017_s16] sm:$0xff] %v2352_v23  ;;  %v2355_v42 = vadd.f32 %v2654_v55, %v5012_v60 }
 0x4db   : > { %2415 = vst [vmem:[%s5017_s16 + $0x8] sm:$0xff] %v2355_v42 }
 0x4ea   : > { %v2655_v13 = vpop.f32.mrb[36].mxu0 }
 0x4eb   : > { %v2656_v18 = vpop.f32.mrb[37].mxu0 }
 0x4ec   : > { %v2657_v27 = vadd.f32 %v2656_v18, %v2655_v13  ;;  %v2658_v40 = vpop.f32.mrb[38].mxu0 }
 0x4ed   : > { %v2659_v34 = vpop.f32.mrb[39].mxu0 }
 0x4ee   : > { %v2360_v44 = vadd.f32 %v2657_v27, %v5012_v60  ;;  %v2660_v5 = vadd.f32 %v2659_v34, %v2658_v40 }
 0x4f0   : > { %2416 = vst [vmem:[%s5017_s16 + $0x10] sm:$0xff] %v2360_v44  ;;  %v2363_v35 = vadd.f32 %v2660_v5, %v5012_v60 }
 0x4f2   : > { %2417 = vst [vmem:[%s5017_s16 + $0x18] sm:$0xff] %v2363_v35 }
 0x4fd   : > { %v2661_v6 = vpop.f32.mrb[40].mxu0 }
 0x4fe   : > { %v2662_v56 = vpop.f32.mrb[41].mxu0 }
 0x4ff   : > { %v2663_v59 = vadd.f32 %v2662_v56, %v2661_v6  ;;  %v2664_v2 = vpop.f32.mrb[42].mxu0 }
 0x500   : > { %v2665_v8 = vpop.f32.mrb[43].mxu0 }
 0x501   : > { %v2368_v28 = vadd.f32 %v2663_v59, %v5012_v60  ;;  %v2666_v26 = vadd.f32 %v2665_v8, %v2664_v2 }
 0x503   : > { %2418 = vst [vmem:[%s5017_s16 + $0x20] sm:$0xff] %v2368_v28  ;;  %v2371_v20 = vadd.f32 %v2666_v26, %v5012_v60 }
 0x505   : > { %2419 = vst [vmem:[%s5017_s16 + $0x28] sm:$0xff] %v2371_v20 }
 0x50f   : > { %v2667_v58 = vpop.f32.mrb[44].mxu0 }
 0x510   : > { %v2668_v12 = vpop.f32.mrb[45].mxu0 }
 0x511   : > { %v2669_v15 = vadd.f32 %v2668_v12, %v2667_v58  ;;  %v2670_v11 = vpop.f32.mrb[46].mxu0 }
 0x512   : > { %v2671_v7 = vpop.f32.mrb[47].mxu0 }
 0x513   : > { %v2376_v51 = vadd.f32 %v2669_v15, %v5012_v60  ;;  %v2672_v61 = vadd.f32 %v2671_v7, %v2670_v11 }
 0x515   : > { %2420 = vst [vmem:[%s5017_s16 + $0x30] sm:$0xff] %v2376_v51  ;;  %v2379_v14 = vadd.f32 %v2672_v61, %v5012_v60 }
 0x517   : > { %2421 = vst [vmem:[%s5017_s16 + $0x38] sm:$0xff] %v2379_v14  ;;  %v2673_v37 = vpop.f32.mrb[48].mxu0 }
 0x518   : > { %v2674_v47 = vpop.f32.mrb[49].mxu0 }
 0x519   : > { %v2675_v36 = vadd.f32 %v2674_v47, %v2673_v37  ;;  %v2676_v52 = vpop.f32.mrb[50].mxu0 }
 0x51a   : > { %v2677_v29 = vpop.f32.mrb[51].mxu0 }
 0x51b   : > { %v2384_v1 = vadd.f32 %v2675_v36, %v5012_v60  ;;  %v2678_v33 = vadd.f32 %v2677_v29, %v2676_v52 }
 0x51d   : > { %2422 = vst [vmem:[%s5017_s16 + $0x40] sm:$0xff] %v2384_v1  ;;  %v2387_v62 = vadd.f32 %v2678_v33, %v5012_v60 }
 0x51f   : > { %2423 = vst [vmem:[%s5017_s16 + $0x48] sm:$0xff] %v2387_v62 }
 0x520   : > { %v2679_v16 = vpop.f32.mrb[52].mxu0 }
 0x521   : > { %v2680_v32 = vpop.f32.mrb[53].mxu0 }
 0x522   : > { %v2681_v3 = vadd.f32 %v2680_v32, %v2679_v16  ;;  %v2682_v39 = vpop.f32.mrb[54].mxu0 }
 0x523   : > { %v2683_v38 = vpop.f32.mrb[55].mxu0 }
 0x524   : > { %v2392_v31 = vadd.f32 %v2681_v3, %v5012_v60  ;;  %v2684_v9 = vadd.f32 %v2683_v38, %v2682_v39 }
 0x526   : > { %2424 = vst [vmem:[%s5017_s16 + $0x50] sm:$0xff] %v2392_v31  ;;  %v2395_v53 = vadd.f32 %v2684_v9, %v5012_v60 }
 0x528   : > { %2425 = vst [vmem:[%s5017_s16 + $0x58] sm:$0xff] %v2395_v53 }
 0x529   : > { %v2685_v22 = vpop.f32.mrb[32].mxu1 }
 0x52a   : > { %v2686_v0 = vpop.f32.mrb[33].mxu1 }
 0x52b   : > { %v2687_v43 = vadd.f32 %v2686_v0, %v2685_v22  ;;  %v2688_v49 = vpop.f32.mrb[34].mxu1 }
 0x52c   : > { %v2689_v30 = vpop.f32.mrb[35].mxu1 }
 0x52d   : > { %v2400_v41 = vadd.f32 %v2687_v43, %v5012_v60  ;;  %v2690_v50 = vadd.f32 %v2689_v30, %v2688_v49 }
 0x52f   : > { %2426 = vst [vmem:[%s5017_s16 + $0x60] sm:$0xff] %v2400_v41  ;;  %v2403_v19 = vadd.f32 %v2690_v50, %v5012_v60 }
 0x531   : > { %2427 = vst [vmem:[%s5017_s16 + $0x68] sm:$0xff] %v2403_v19  ;;  %v2691_v57 = vpop.f32.mrb[36].mxu1 }
 0x532   : > { %v2692_v10 = vpop.f32.mrb[37].mxu1 }
 0x533   : > { %v2693_v21 = vadd.f32 %v2692_v10, %v2691_v57  ;;  %v2694_v54 = vpop.f32.mrb[38].mxu1 }
 0x534   : > { %v2695_v48 = vpop.f32.mrb[39].mxu1 }
 0x535   : > { %v2408_v4 = vadd.f32 %v2693_v21, %v5012_v60  ;;  %v2696_v45 = vadd.f32 %v2695_v48, %v2694_v54 }
 0x537   : > { %2428 = vst [vmem:[%s5017_s16 + $0x70] sm:$0xff] %v2408_v4  ;;  %v2411_v63 = vadd.f32 %v2696_v45, %v5012_v60 }
 0x539   : > { %2429 = vst [vmem:[%s5017_s16 + $0x78] sm:$0xff] %v2411_v63 }
 0x53a   : > { %3332 = shalt.err (!%p3329_p4)
}
 0x53b   : > { %s3333_s23 = scalar_lea.hbm %s5052_s12, 2048  ;;  %s3337_s16 = scalar_lea.hbm %s5221_s28, 4096 }
 0x53c   : > { %p3334_p9 = scmp.ne.s32.totalorder %s5052_s12, %s3333_s23  ;;  %p3338_p8 = scmp.lt.u32.totalorder %s5052_s12, %s5221_s28 }
 0x53d   : > { %p3339_p13 = scmp.lt.u32.totalorder %s3337_s16, %s3333_s23  ;;  %p3341_p10 = scmp.lt.u32.totalorder %s3333_s23, %s5052_s12 }
 0x53e   : > { %p3335_p0 = pnand %p3334_p9, %p3618_p5 }
 0x53f   : > { %p3340_p6 = por %p3339_p13, %p3338_p8 }
 0x540   : > { %p3336_p11 = pneg %p3335_p0 }
 0x541   : > { %p3342_p3 = por %p3341_p10, %p3340_p6 }
 0x543   : > { %p3343_p7 = pnand %p3342_p3, %p3336_p11 }
 0x545   : > { %3346 = shalt.err (!%p3343_p7)
}
 0x546   : > { %s3405_s17 = smov 128   ;;  %s3406_s13 = smov 8  }
 0x547   : > { %2727 = dma.vmem_to_hbm [thread:$0]  (%p3618_p5), %s5054_s30, 2048, %s5052_s12, %s2431_s21, %s3405_s17, %s3405_s17, %s3406_s13  }
 0x548 PF: > { %s5222_s27 = sld [smem:[#allocation15_spill]]  ;;  %s5223_s24 = sld [smem:[#allocation16_spill]] }
 0x549   : > { %p5225_p1 = scmp.ge.s32.totalorder %s3393_s20, 2 }
 0x54e   : > { %s2459_s10 = sand.u32 1, %s5222_s27   ;;  %p5224_p12 = scmp.ne.s32.totalorder %s5223_s24, 0 }
 0x54f   : > { %s2460_s23 = scalar_lea.sflag [#allocation4], %s2459_s10 }
 0x550   : > { %p2744_p2 = pnand %p5225_p1, %p5224_p12 }
 0x552   : > { %3376 = dma.done.wait (!%p2744_p2), %s2460_s23, 2048  }
 0x553   : > { %3378 = vsyncadd (!%p2744_p2), %s2460_s23, 4294965248  ;;  %p26_p4 = scmp.ge.s32.totalorder %s3604_s11, 4   ;;  %s5226_s17 = smov %s3385_s18 }
 0x554   : > { %s5227_s18 = smov %s3389_s19  ;;  %s5228_s19 = smov %s3614_s26 }
 0x555   : > { %s5229_s20 = smov %s3604_s11  ;;  %28 = sbr.rel (!%p26_p4) target bundleno = 11 (0xb), region = 121 }
 0x55c   :  { %2465 = vsyncpa [#allocation3], 1 }
 0x55d   :  { %2467 = vsyncpa [#allocation3 + $0x1], 1 }
 0x55e   :  { %2468 = vsyncpa [#allocation6], 1 }
 0x55f   :  { %2469 = vsyncpa [#allocation9], 1 }
 0x560   :  { %2470 = vsyncpa [#allocation4], 1 }
 0x561   :  { %2472 = vsyncpa [#allocation4 + $0x1], 1 }

</bundles_post_ra>
